<compile_context>
chip_gen: v7x
topology: tpu7x:2x2x1
jax: 0.10.0
libtpu: 0.0.40
codegen_flags: <defaults>
</compile_context>

<pallas_src>
import numpy as np
import jax
import jax.numpy as jnp
from jax.experimental import pallas as pl
from jax.experimental.pallas import tpu as pltpu

NUM_VERTS = 778
NUM_JOINTS = 16
NUM_BETAS = 10
POSE_FEAT = 9 * (NUM_JOINTS - 1)          # 135
FEAT = NUM_BETAS + POSE_FEAT              # 145
VPAD = 896                                # 778 padded up to 7 * 128 lanes
CM3 = 3 * VPAD                            # coordinate-major flat length

CIRCLE_V_ID = np.array([108, 79, 78, 121, 214, 215, 279, 239, 234, 92, 38,
                        122, 118, 117, 119, 120], dtype=np.int64)

MANO_PARENTS = np.array([-1, 0, 1, 2, 0, 4, 5, 0, 7, 8, 0, 10, 11, 0, 13, 14],
                        dtype=np.int32)

# MANO kinematic tree has depth 3 (wrist -> 5 chains of 3 joints).
_LVL1 = np.array([1, 4, 7, 10, 13])
_LVL2 = np.array([2, 5, 8, 11, 14])
_LVL3 = np.array([3, 6, 9, 12, 15])
_CHAIN_ORDER = np.concatenate([[0], _LVL1, _LVL2, _LVL3])
_CHAIN_INV = np.argsort(_CHAIN_ORDER)

# TODO(synk): faces / sealed_faces are integer topology buffers used only for
# rendering, not part of the forward compute; they are not reproduced here.


# ---------------- fused Pallas kernel: blendshapes + LBS + seal centroid ----
def mano_kernel(feat_ref, dirs_ref, vtpl_ref, akr_ref, akt_ref, wT_ref,
                transl_ref, mask_ref, verts_ref, center_ref):
    # Blendshapes: (1, 145) @ (145, 3*VPAD) -> (1, 3*VPAD) coordinate-major
    # (x-row | y-row | z-row), then add the template.  Single MXU push.
    vposed_flat = jnp.dot(feat_ref[0], dirs_ref[...],
                          preferred_element_type=jnp.float32) + vtpl_ref[...]
    vposed = vposed_flat.reshape(3, VPAD)               # (3, V): lanes = verts

    # Skinning: stacked per-(coord, joint) rows.  m[c*16+j, v] =
    #   A[j,c,:3] . vposed[:,v] + A[j,c,3]   -> one (48,3)@(3,V) matmul.
    m = jnp.dot(akr_ref[0], vposed,
                preferred_element_type=jnp.float32) + akt_ref[0]   # (48, V)
    m = m.reshape(3, NUM_JOINTS, VPAD)

    # Blend over joints (sublane reduce); vertices stay on lanes.
    verts = jnp.sum(m * wT_ref[...][None, :, :], axis=1)           # (3, V)
    verts = verts + transl_ref[0]                                  # + (3, 1)
    verts_ref[0] = verts

    # Sealed-vertex centroid: masked mean over CIRCLE_V_ID (lane reduce).
    center_ref[0] = jnp.sum(verts * mask_ref[...], axis=-1, keepdims=True)


def mano_skin_pallas(feat, dirs_cm, v_template_cm, akr, akt, wT, transl_b31,
                     circle_mask):
    B = feat.shape[0]
    return pl.pallas_call(
        mano_kernel,
        out_shape=(jax.ShapeDtypeStruct((B, 3, VPAD), jnp.float32),
                   jax.ShapeDtypeStruct((B, 3, 1), jnp.float32)),
        grid=(B,),
        in_specs=[
            pl.BlockSpec((1, 1, FEAT), lambda b: (b, 0, 0)),
            pl.BlockSpec((FEAT, CM3), lambda b: (0, 0)),
            pl.BlockSpec((1, CM3), lambda b: (0, 0)),
            pl.BlockSpec((1, 3 * NUM_JOINTS, 3), lambda b: (b, 0, 0)),
            pl.BlockSpec((1, 3 * NUM_JOINTS, 1), lambda b: (b, 0, 0)),
            pl.BlockSpec((NUM_JOINTS, VPAD), lambda b: (0, 0)),
            pl.BlockSpec((1, 3, 1), lambda b: (b, 0, 0)),
            pl.BlockSpec((1, VPAD), lambda b: (0, 0)),
        ],
        out_specs=[
            pl.BlockSpec((1, 3, VPAD), lambda b: (b, 0, 0)),
            pl.BlockSpec((1, 3, 1), lambda b: (b, 0, 0)),
        ],
        compiler_params=pltpu.CompilerParams(dimension_semantics=("parallel",)),
    )(feat, dirs_cm, v_template_cm, akr, akt, wT, transl_b31, circle_mask)


# ---------------- small JAX glue (matches smplx.lbs helpers) ----------------
def batch_rodrigues(rot_vecs):
    angle = jnp.linalg.norm(rot_vecs + 1e-8, axis=1, keepdims=True)   # (N, 1)
    rot_dir = rot_vecs / angle
    cos = jnp.cos(angle)[..., None]
    sin = jnp.sin(angle)[..., None]
    rx, ry, rz = jnp.split(rot_dir, 3, axis=1)
    zeros = jnp.zeros_like(rx)
    K = jnp.concatenate([zeros, -rz, ry,
                         rz, zeros, -rx,
                         -ry, rx, zeros], axis=1).reshape(-1, 3, 3)
    ident = jnp.eye(3, dtype=rot_vecs.dtype)[None]
    return ident + sin * K + (1.0 - cos) * jnp.matmul(K, K)


def _transforms_mat(rot_mats, joints):
    B = joints.shape[0]
    rel = joints.at[:, 1:].add(-joints[:, MANO_PARENTS[1:]])          # (B,16,3)
    top = jnp.concatenate([rot_mats, rel[..., None]], axis=-1)        # (B,16,3,4)
    bottom = jnp.broadcast_to(
        jnp.array([0.0, 0.0, 0.0, 1.0], dtype=rot_mats.dtype),
        (B, NUM_JOINTS, 1, 4))
    return jnp.concatenate([top, bottom], axis=-2)                    # (B,16,4,4)


def _rel_transforms(transforms, joints):
    B = joints.shape[0]
    jh = jnp.concatenate(
        [joints[..., None], jnp.zeros((B, NUM_JOINTS, 1, 1), joints.dtype)],
        axis=2)                                                       # (B,16,4,1)
    A = transforms - jnp.pad(jnp.matmul(transforms, jh),
                             ((0, 0), (0, 0), (0, 0), (3, 0)))
    return transforms[:, :, :3, 3], A


def batch_rigid_transform_mano(rot_mats, joints):
    """Kinematic chain via 3 batched level matmuls (MANO tree depth = 3)."""
    tm = _transforms_mat(rot_mats, joints)
    g0 = tm[:, 0]
    g1 = jnp.matmul(g0[:, None], tm[:, _LVL1])                        # (B,5,4,4)
    g2 = jnp.matmul(g1, tm[:, _LVL2])
    g3 = jnp.matmul(g2, tm[:, _LVL3])
    transforms = jnp.concatenate([g0[:, None], g1, g2, g3],
                                 axis=1)[:, _CHAIN_INV]
    return _rel_transforms(transforms, joints)


def batch_rigid_transform_ref(rot_mats, joints):
    """Generic sequential chain (used by the plain-JAX reference)."""
    tm = _transforms_mat(rot_mats, joints)
    chain = [tm[:, 0]]
    for i in range(1, NUM_JOINTS):
        chain.append(jnp.matmul(chain[int(MANO_PARENTS[i])], tm[:, i]))
    return _rel_transforms(jnp.stack(chain, axis=1), joints)


# ---------------- MANOLayer.forward -----------------------------------------
def mano_forward(params, global_orient, hand_pose, betas, transl):
    B = betas.shape[0]
    # flat_hand_mean=True -> pose_mean = 0; use_pca=False -> raw axis-angle.
    full_pose = jnp.concatenate([global_orient, hand_pose], axis=1)   # (B, 48)
    rot_mats = batch_rodrigues(full_pose.reshape(-1, 3)).reshape(
        B, NUM_JOINTS, 3, 3)
    ident = jnp.eye(3, dtype=jnp.float32)
    pose_feature = (rot_mats[:, 1:] - ident).reshape(B, POSE_FEAT)
    feat = jnp.concatenate([betas, pose_feature], axis=1).reshape(B, 1, FEAT)

    # Rest joints from precomputed regressor contractions (no v_shaped).
    joints_rest = params['J_template'][None] + jnp.einsum(
        'bk,jck->bjc', betas, params['J_shapedirs'])
    posed_joints, A = batch_rigid_transform_mano(rot_mats, joints_rest)

    # Stacked transform rows: row index = c*16 + j.
    akr = jnp.transpose(A[:, :, :3, :3], (0, 2, 1, 3)).reshape(
        B, 3 * NUM_JOINTS, 3)
    akt = jnp.transpose(A[:, :, :3, 3], (0, 2, 1)).reshape(
        B, 3 * NUM_JOINTS, 1)

    verts_cm, centers_cm = mano_skin_pallas(
        feat, params['dirs_cm'], params['v_template_cm'], akr, akt,
        params['lbs_weights_T'], transl.reshape(B, 3, 1),
        params['circle_mask'])

    verts = jnp.transpose(verts_cm[:, :, :NUM_VERTS], (0, 2, 1))      # (B,778,3)
    centers = jnp.transpose(centers_cm, (0, 2, 1))                    # (B,1,3)
    joints = posed_joints + transl[:, None, :]
    sealed = jnp.concatenate([verts, centers], axis=1)
    # smplx MANO (default joint_mapper=None) returns the 16 LBS joints.
    return {'joints': joints, 'vertices': verts, 'vertices.sealed': sealed}


# ---------------- plain-JAX reference (smplx layout) for validation ---------
def reference_forward(raw, global_orient, hand_pose, betas, transl):
    B = betas.shape[0]
    full_pose = jnp.concatenate([global_orient, hand_pose], axis=1)
    rot_mats = batch_rodrigues(full_pose.reshape(-1, 3)).reshape(
        B, NUM_JOINTS, 3, 3)
    pose_feature = (rot_mats[:, 1:] - jnp.eye(3, dtype=jnp.float32)).reshape(
        B, POSE_FEAT)
    v_shaped = raw['v_template'][None] + jnp.einsum(
        'bk,vck->bvc', betas, raw['shapedirs'])
    v_posed = v_shaped + jnp.einsum('bp,vcp->bvc', pose_feature, raw['posedirs'])
    joints_rest = jnp.einsum('jv,bvc->bjc', raw['J_regressor'], v_shaped)
    posed_joints, A = batch_rigid_transform_ref(rot_mats, joints_rest)
    T = jnp.einsum('vj,bjcd->bvcd', raw['lbs_weights'], A)
    vph = jnp.concatenate(
        [v_posed, jnp.ones((B, NUM_VERTS, 1), jnp.float32)], axis=-1)
    verts = jnp.einsum('bvcd,bvd->bvc', T, vph)[..., :3] + transl[:, None, :]
    joints = posed_joints + transl[:, None, :]
    centers = jnp.mean(verts[:, CIRCLE_V_ID], axis=1, keepdims=True)
    sealed = jnp.concatenate([verts, centers], axis=1)
    return {'joints': joints, 'vertices': verts, 'vertices.sealed': sealed}


# ---------------- deterministic synthetic MANO parameters -------------------
def init_params(key):
    k = jax.random.split(key, 5)
    v_template = jax.random.normal(k[0], (NUM_VERTS, 3), jnp.float32) * 0.01
    shapedirs = jax.random.normal(k[1], (NUM_VERTS, 3, NUM_BETAS),
                                  jnp.float32) * 1e-3
    posedirs = jax.random.normal(k[2], (NUM_VERTS, 3, POSE_FEAT),
                                 jnp.float32) * 1e-3
    jreg = jnp.abs(jax.random.normal(k[3], (NUM_JOINTS, NUM_VERTS), jnp.float32))
    J_regressor = jreg / jnp.sum(jreg, axis=1, keepdims=True)
    w = jnp.abs(jax.random.normal(k[4], (NUM_VERTS, NUM_JOINTS), jnp.float32))
    lbs_weights = w / jnp.sum(w, axis=1, keepdims=True)

    pad = VPAD - NUM_VERTS
    # Coordinate-major, lane-padded direction matrix: rows = [betas; pose],
    # columns = c*VPAD + v.
    dirs = jnp.concatenate([jnp.transpose(shapedirs, (2, 1, 0)),
                            jnp.transpose(posedirs, (2, 1, 0))], axis=0)
    dirs_cm = jnp.pad(dirs, ((0, 0), (0, 0), (0, pad))).reshape(FEAT, CM3)
    v_template_cm = jnp.pad(v_template.T, ((0, 0), (0, pad))).reshape(1, CM3)
    lbs_weights_T = jnp.pad(lbs_weights.T, ((0, 0), (0, pad)))        # (16,VPAD)
    circle_mask = jnp.zeros((1, VPAD), jnp.float32).at[
        0, CIRCLE_V_ID].set(1.0 / CIRCLE_V_ID.shape[0])
    # Precomputed joint-regressor contractions (delete v_shaped round trip).
    J_template = J_regressor @ v_template                             # (16, 3)
    J_shapedirs = jnp.einsum('jv,vck->jck', J_regressor, shapedirs)   # (16,3,10)

    params = {
        'dirs_cm': dirs_cm,
        'v_template_cm': v_template_cm,
        'lbs_weights_T': lbs_weights_T,
        'circle_mask': circle_mask,
        'J_template': J_template,
        'J_shapedirs': J_shapedirs,
    }
    raw = {
        'v_template': v_template, 'shapedirs': shapedirs, 'posedirs': posedirs,
        'J_regressor': J_regressor, 'lbs_weights': lbs_weights,
    }
    return params, raw


if __name__ == "__main__":
    key = jax.random.PRNGKey(0)
    kp, ki = jax.random.split(key)
    params, raw = init_params(kp)

    B = 2
    k1, k2, k3, k4 = jax.random.split(ki, 4)
    global_orient = jax.random.normal(k1, (B, 3), jnp.float32) * 0.2
    hand_pose = jax.random.normal(k2, (B, 45), jnp.float32) * 0.2
    betas = jax.random.normal(k3, (B, NUM_BETAS), jnp.float32)
    transl = jax.random.normal(k4, (B, 3), jnp.float32) * 0.1

    fwd = jax.jit(lambda go, hp, b, t: mano_forward(params, go, hp, b, t))
    out = fwd(global_orient, hand_pose, betas, transl)
    out = jax.tree_util.tree_map(jax.block_until_ready, out)

    assert out['joints'].shape == (B, NUM_JOINTS, 3)
    assert out['vertices'].shape == (B, NUM_VERTS, 3)
    assert out['vertices.sealed'].shape == (B, NUM_VERTS + 1, 3)
    assert all(bool(jnp.all(jnp.isfinite(v))) for v in out.values())

    # Cross-check against a plain-JAX smplx-layout reference.
    ref = jax.jit(lambda go, hp, b, t: reference_forward(raw, go, hp, b, t))(
        global_orient, hand_pose, betas, transl)
    np.testing.assert_allclose(np.asarray(out['vertices']),
                               np.asarray(ref['vertices']),
                               rtol=5e-2, atol=5e-3)
    np.testing.assert_allclose(np.asarray(out['joints']),
                               np.asarray(ref['joints']),
                               rtol=5e-2, atol=5e-3)
    np.testing.assert_allclose(np.asarray(out['vertices.sealed']),
                               np.asarray(ref['vertices.sealed']),
                               rtol=5e-2, atol=5e-3)
    print("KERNEL_OK")
</pallas_src>

<mosaic_0001>
module attributes {stable_mosaic.version = 11 : i64} {
  func.func @mano_kernel(%arg0: i32, %arg1: memref<1x1x145xf32, #tpu.memory_space<vmem>>, %arg2: memref<145x2688xf32, #tpu.memory_space<vmem>>, %arg3: memref<1x2688xf32, #tpu.memory_space<vmem>>, %arg4: memref<1x48x3xf32, #tpu.memory_space<vmem>>, %arg5: memref<1x48x1xf32, #tpu.memory_space<vmem>>, %arg6: memref<16x896xf32, #tpu.memory_space<vmem>>, %arg7: memref<1x3x1xf32, #tpu.memory_space<vmem>>, %arg8: memref<1x896xf32, #tpu.memory_space<vmem>>, %arg9: memref<1x3x896xf32, #tpu.memory_space<vmem>>, %arg10: memref<1x3x1xf32, #tpu.memory_space<vmem>>) attributes {dimension_semantics = [#tpu.dimension_semantics<parallel>], iteration_bounds = array<i64: 2>, scalar_prefetch = 0 : i64, scratch_operands = 0 : i64, tpu.core_type = #tpu.core_type<tc>, window_params = [{transform_indices = @transform_0, window_bounds = array<i64: 1, 1, 145>}, {pipeline_mode = #tpu.pipeline_mode<synchronous>, transform_indices = @transform_1, window_bounds = array<i64: 145, 2688>}, {pipeline_mode = #tpu.pipeline_mode<synchronous>, transform_indices = @transform_2, window_bounds = array<i64: 1, 2688>}, {transform_indices = @transform_3, window_bounds = array<i64: 1, 48, 3>}, {transform_indices = @transform_4, window_bounds = array<i64: 1, 48, 1>}, {pipeline_mode = #tpu.pipeline_mode<synchronous>, transform_indices = @transform_5, window_bounds = array<i64: 16, 896>}, {transform_indices = @transform_6, window_bounds = array<i64: 1, 3, 1>}, {pipeline_mode = #tpu.pipeline_mode<synchronous>, transform_indices = @transform_7, window_bounds = array<i64: 1, 896>}, {transform_indices = @transform_8, window_bounds = array<i64: 1, 3, 896>}, {transform_indices = @transform_9, window_bounds = array<i64: 1, 3, 1>}]} {
    %c0 = arith.constant 0 : index
    %c0_0 = arith.constant 0 : index
    %c0_1 = arith.constant 0 : index
    %0 = vector.load %arg1[%c0, %c0_0, %c0_1] : memref<1x1x145xf32, #tpu.memory_space<vmem>>, vector<1x1x145xf32>
    %1 = vector.shape_cast %0 : vector<1x1x145xf32> to vector<1x145xf32>
    %c0_2 = arith.constant 0 : index
    %c0_3 = arith.constant 0 : index
    %2 = vector.load %arg2[%c0_2, %c0_3] : memref<145x2688xf32, #tpu.memory_space<vmem>>, vector<145x2688xf32>
    %cst = arith.constant dense<0.000000e+00> : vector<1x2688xf32>
    %3 = tpu.matmul %1, %2, %cst {dimension_numbers = #tpu.dot_dimension_numbers<[1], [0], [0], [1], [0, 0, 1, 1], [], []>} : vector<1x145xf32>, vector<145x2688xf32>, vector<1x2688xf32> -> vector<1x2688xf32>
    %c0_4 = arith.constant 0 : index
    %c0_5 = arith.constant 0 : index
    %4 = vector.load %arg3[%c0_4, %c0_5] : memref<1x2688xf32, #tpu.memory_space<vmem>>, vector<1x2688xf32>
    %5 = arith.addf %3, %4 : vector<1x2688xf32>
    %6 = vector.shape_cast %5 : vector<1x2688xf32> to vector<3x896xf32>
    %c0_6 = arith.constant 0 : index
    %c0_7 = arith.constant 0 : index
    %c0_8 = arith.constant 0 : index
    %7 = vector.load %arg4[%c0_6, %c0_7, %c0_8] : memref<1x48x3xf32, #tpu.memory_space<vmem>>, vector<1x48x3xf32>
    %8 = vector.shape_cast %7 : vector<1x48x3xf32> to vector<48x3xf32>
    %cst_9 = arith.constant dense<0.000000e+00> : vector<48x896xf32>
    %9 = tpu.matmul %8, %6, %cst_9 {dimension_numbers = #tpu.dot_dimension_numbers<[1], [0], [0], [1], [0, 0, 1, 1], [], []>} : vector<48x3xf32>, vector<3x896xf32>, vector<48x896xf32> -> vector<48x896xf32>
    %c0_10 = arith.constant 0 : index
    %c0_11 = arith.constant 0 : index
    %c0_12 = arith.constant 0 : index
    %10 = vector.load %arg5[%c0_10, %c0_11, %c0_12] : memref<1x48x1xf32, #tpu.memory_space<vmem>>, vector<1x48x1xf32>
    %11 = vector.shape_cast %10 : vector<1x48x1xf32> to vector<48x1xf32>
    %12 = vector.broadcast %11 : vector<48x1xf32> to vector<48x896xf32>
    %13 = arith.addf %9, %12 : vector<48x896xf32>
    %14 = vector.shape_cast %13 : vector<48x896xf32> to vector<3x16x896xf32>
    %c0_13 = arith.constant 0 : index
    %c0_14 = arith.constant 0 : index
    %15 = vector.load %arg6[%c0_13, %c0_14] : memref<16x896xf32, #tpu.memory_space<vmem>>, vector<16x896xf32>
    %16 = vector.shape_cast %15 : vector<16x896xf32> to vector<1x16x896xf32>
    %17 = vector.broadcast %16 : vector<1x16x896xf32> to vector<3x16x896xf32>
    %18 = arith.mulf %14, %17 : vector<3x16x896xf32>
    %cst_15 = arith.constant dense<0.000000e+00> : vector<3x896xf32>
    %19 = vector.multi_reduction <add>, %18, %cst_15 [1] : vector<3x16x896xf32> to vector<3x896xf32>
    %c0_16 = arith.constant 0 : index
    %c0_17 = arith.constant 0 : index
    %c0_18 = arith.constant 0 : index
    %20 = vector.load %arg7[%c0_16, %c0_17, %c0_18] : memref<1x3x1xf32, #tpu.memory_space<vmem>>, vector<1x3x1xf32>
    %21 = vector.shape_cast %20 : vector<1x3x1xf32> to vector<3x1xf32>
    %22 = vector.broadcast %21 : vector<3x1xf32> to vector<3x896xf32>
    %23 = arith.addf %19, %22 : vector<3x896xf32>
    %c0_19 = arith.constant 0 : index
    %c0_20 = arith.constant 0 : index
    %c0_21 = arith.constant 0 : index
    %24 = vector.load %arg9[%c0_19, %c0_20, %c0_21] : memref<1x3x896xf32, #tpu.memory_space<vmem>>, vector<1x3x896xf32>
    %25 = vector.shape_cast %24 : vector<1x3x896xf32> to vector<3x896xf32>
    %26 = vector.shape_cast %23 : vector<3x896xf32> to vector<1x3x896xf32>
    tpu.vector_store %arg9[%c0_19, %c0_20, %c0_21], %26 {strides = array<i32>} : memref<1x3x896xf32, #tpu.memory_space<vmem>>, vector<1x3x896xf32>,
    %c0_22 = arith.constant 0 : index
    %c0_23 = arith.constant 0 : index
    %27 = vector.load %arg8[%c0_22, %c0_23] : memref<1x896xf32, #tpu.memory_space<vmem>>, vector<1x896xf32>
    %28 = vector.broadcast %27 : vector<1x896xf32> to vector<3x896xf32>
    %29 = arith.mulf %23, %28 : vector<3x896xf32>
    %cst_24 = arith.constant dense<0.000000e+00> : vector<3xf32>
    %30 = vector.multi_reduction <add>, %29, %cst_24 [1] : vector<3x896xf32> to vector<3xf32>
    %31 = vector.shape_cast %30 : vector<3xf32> to vector<3x1xf32>
    %c0_25 = arith.constant 0 : index
    %c0_26 = arith.constant 0 : index
    %c0_27 = arith.constant 0 : index
    %32 = vector.load %arg10[%c0_25, %c0_26, %c0_27] : memref<1x3x1xf32, #tpu.memory_space<vmem>>, vector<1x3x1xf32>
    %33 = vector.shape_cast %32 : vector<1x3x1xf32> to vector<3x1xf32>
    %34 = vector.shape_cast %31 : vector<3x1xf32> to vector<1x3x1xf32>
    tpu.vector_store %arg10[%c0_25, %c0_26, %c0_27], %34 {strides = array<i32>} : memref<1x3x1xf32, #tpu.memory_space<vmem>>, vector<1x3x1xf32>,
    return
  }
  func.func @transform_0(%arg0: i32) -> (i32, i32, i32) {
    %c0_i32 = arith.constant 0 : i32
    %c0_i32_0 = arith.constant 0 : i32
    %c0_i32_1 = arith.constant 0 : i32
    return %arg0, %c0_i32, %c0_i32_0 : i32, i32, i32
  }
  func.func @transform_1(%arg0: i32) -> (i32, i32) {
    %c0_i32 = arith.constant 0 : i32
    %c0_i32_0 = arith.constant 0 : i32
    %c0_i32_1 = arith.constant 0 : i32
    return %c0_i32, %c0_i32_0 : i32, i32
  }
  func.func @transform_2(%arg0: i32) -> (i32, i32) {
    %c0_i32 = arith.constant 0 : i32
    %c0_i32_0 = arith.constant 0 : i32
    %c0_i32_1 = arith.constant 0 : i32
    return %c0_i32, %c0_i32_0 : i32, i32
  }
  func.func @transform_3(%arg0: i32) -> (i32, i32, i32) {
    %c0_i32 = arith.constant 0 : i32
    %c0_i32_0 = arith.constant 0 : i32
    %c0_i32_1 = arith.constant 0 : i32
    return %arg0, %c0_i32, %c0_i32_0 : i32, i32, i32
  }
  func.func @transform_4(%arg0: i32) -> (i32, i32, i32) {
    %c0_i32 = arith.constant 0 : i32
    %c0_i32_0 = arith.constant 0 : i32
    %c0_i32_1 = arith.constant 0 : i32
    return %arg0, %c0_i32, %c0_i32_0 : i32, i32, i32
  }
  func.func @transform_5(%arg0: i32) -> (i32, i32) {
    %c0_i32 = arith.constant 0 : i32
    %c0_i32_0 = arith.constant 0 : i32
    %c0_i32_1 = arith.constant 0 : i32
    return %c0_i32, %c0_i32_0 : i32, i32
  }
  func.func @transform_6(%arg0: i32) -> (i32, i32, i32) {
    %c0_i32 = arith.constant 0 : i32
    %c0_i32_0 = arith.constant 0 : i32
    %c0_i32_1 = arith.constant 0 : i32
    return %arg0, %c0_i32, %c0_i32_0 : i32, i32, i32
  }
  func.func @transform_7(%arg0: i32) -> (i32, i32) {
    %c0_i32 = arith.constant 0 : i32
    %c0_i32_0 = arith.constant 0 : i32
    %c0_i32_1 = arith.constant 0 : i32
    return %c0_i32, %c0_i32_0 : i32, i32
  }
  func.func @transform_8(%arg0: i32) -> (i32, i32, i32) {
    %c0_i32 = arith.constant 0 : i32
    %c0_i32_0 = arith.constant 0 : i32
    %c0_i32_1 = arith.constant 0 : i32
    return %arg0, %c0_i32, %c0_i32_0 : i32, i32, i32
  }
  func.func @transform_9(%arg0: i32) -> (i32, i32, i32) {
    %c0_i32 = arith.constant 0 : i32
    %c0_i32_0 = arith.constant 0 : i32
    %c0_i32_1 = arith.constant 0 : i32
    return %arg0, %c0_i32, %c0_i32_0 : i32, i32, i32
  }
}

</mosaic_0001>

<bundles_post_ra>
// kernel: _lambda_.1
= control target key start
LH: loop header
LB: loop body
LE: loop exit
PB: predicated region body
PF: predicated region fallthrough
CT: control target
= control target key end

     0   :  { %s3392_s30 = smov 0   ;;  %s5199_s0 = inlined_call_operand.vmem [shape: f32[2,1,145], index: 0, kind: input, shape index: {}]   ;;  %s5200_s1 = inlined_call_operand.vmem [shape: f32[145,2688], index: 1, kind: input, shape index: {}]   ;;  %s5201_s2 = inlined_call_operand.vmem [shape: f32[1,2688], index: 2, kind: input, shape index: {}]   ;;  %s5202_s3 = inlined_call_operand.vmem [shape: f32[2,48,3], index: 3, kind: input, shape index: {}]   ;;  %s5203_s4 = inlined_call_operand.vmem [shape: f32[2,48,1], index: 4, kind: input, shape index: {}]   ;;  %s5204_s5 = inlined_call_operand.vmem [shape: f32[16,896], index: 5, kind: input, shape index: {}]   ;;  %s5205_s6 = inlined_call_operand.vmem [shape: f32[2,3,1], index: 6, kind: input, shape index: {}]   ;;  %s5206_s7 = inlined_call_operand.vmem [shape: f32[1,896], index: 7, kind: input, shape index: {}]   ;;  %s5207_s8 = inlined_call_operand.vmem [shape: f32[2,3,896], index: 8, kind: output, shape index: {0}]   ;;  %s5208_s9 = inlined_call_operand.vmem [shape: f32[2,3,1], index: 9, kind: output, shape index: {1}]  }
   0x1 LB: > { %s2835_s10 = sadd.s32 4294967295, %s3337_s30   ;;  %p2839_p0 = scmp.ge.s32.totalorder %s3337_s30, 1  ;;  %s3337_s30 = sphi %s3392_s30, %s20_s30  }
   0x2   : > { %p318_p1 = scmp.lt.s32.totalorder %s3337_s30, 3 }
   0x4   : > { %p319_p2 = pnand %p2839_p0, %p318_p1 }
   0x5   : > { %v400_v0 = vld [vmem:[%s5200_s1 + $0x8] sm:$0xff] (!%p319_p2)  ;;  %v421_v1 = vld [vmem:[%s5200_s1 + $0xb0] sm:$0xff] (!%p319_p2)  ;;  %v402_v2 = vld [vmem:[%s5200_s1 + $0x18] sm:$0xff] (!%p319_p2)  ;;  %p3510_p3 = scmp.lt.s32.totalorder (!%p319_p2), %s2835_s10, 1  ;;  %v802_v60 = vlaneseq (!%p319_p2)  ;;  %vm919_vm0 = vcmask (!%p319_p2), 138240   ;;  %vm922_vm1 = vcmask (!%p319_p2), 1040384  }
   0x6   : > { %322 = sbr.rel (%p319_p2) target bundleno = 853 (0x355), region = 52  ;;  %v2929_v3 = vpack.c.bf16 (!%p319_p2), %v421_v1, %v400_v0  ;;  %v423_v4 = vld [vmem:[%s5200_s1 + $0xc0] sm:$0xff] (!%p319_p2)  ;;  %v420_v6 = vld [vmem:[%s5200_s1 + $0xa8] sm:$0xff] (!%p319_p2)  ;;  %v401_v9 = vld [vmem:[%s5200_s1 + $0x10] sm:$0xff] (!%p319_p2)  ;;  %vm1768_vm2 = vcmask (!%p319_p2), 1041409   ;;  %vm1771_vm3 = vcmask (!%p319_p2), 1042434  }
   0x7   : > { %v399_v5 = vld [vmem:[%s5200_s1] sm:$0xff] (!%p319_p2)  ;;  %v2965_v7 = vpack.c.bf16 (!%p319_p2), %v423_v4, %v402_v2  ;;  %v422_v10 = vld [vmem:[%s5200_s1 + $0xb8] sm:$0xff] (!%p319_p2)  ;;  %v444_v14 = vld [vmem:[%s5200_s1 + $0x168] sm:$0xff] (!%p319_p2)  ;;  %vm1864_vm4 = vcmask (!%p319_p2), 1042432   ;;  %vm1845_vm5 = vcmask (!%p319_p2), 23552   ;;  %vm2550_vm6 = vcmask (!%p319_p2), 1045509  }
   0x8   : > { %v2931_v8 = vpack.c.bf16 (!%p319_p2), %v420_v6, %v399_v5  ;;  %v442_v11 = vld [vmem:[%s5200_s1 + $0x158] sm:$0xff] (!%p319_p2)  ;;  %2930 = vmatprep.subr.bf16.mxu0 (!%p319_p2), %v2929_v3  ;;  %v2967_v12 = vpack.c.bf16 (!%p319_p2), %v422_v10, %v401_v9  ;;  %v463_v13 = vld [vmem:[%s5200_s1 + $0x200] sm:$0xff] (!%p319_p2)  ;;  %v465_v15 = vld [vmem:[%s5200_s1 + $0x210] sm:$0xff] (!%p319_p2)  ;;  %v3562_v9 = vshrl.u32 (!%p319_p2), %v802_v60, 7  ;;  %vm2554_vm7 = vcmask (!%p319_p2), 1046534  }
   0x9   : > { %2966 = vmatprep.subr.bf16.mxu1 (!%p319_p2), %v2965_v7  ;;  %v2933_v16 = vpack.c.bf16 (!%p319_p2), %v463_v13, %v442_v11  ;;  %v2969_v17 = vpack.c.bf16 (!%p319_p2), %v465_v15, %v444_v14  ;;  %v441_v18 = vld [vmem:[%s5200_s1 + $0x150] sm:$0xff] (!%p319_p2)  ;;  %v462_v19 = vld [vmem:[%s5200_s1 + $0x1f8] sm:$0xff] (!%p319_p2)  ;;  %v443_v20 = vld [vmem:[%s5200_s1 + $0x160] sm:$0xff] (!%p319_p2)  ;;  %vm2711_vm8 = vcmask (!%p319_p2), 2048  }
   0xa   : > { %2932 = vmatpush1.bf16.msra.mxu0 (!%p319_p2), %v2931_v8  ;;  %2968 = vmatpush1.bf16.msra.mxu1 (!%p319_p2), %v2967_v12  ;;  %v2935_v21 = vpack.c.bf16 (!%p319_p2), %v462_v19, %v441_v18  ;;  %v464_v22 = vld [vmem:[%s5200_s1 + $0x208] sm:$0xff] (!%p319_p2)  ;;  %v505_v24 = vld [vmem:[%s5200_s1 + $0x350] sm:$0xff] (!%p319_p2)  ;;  %v486_v27 = vld [vmem:[%s5200_s1 + $0x2b8] sm:$0xff] (!%p319_p2) }
   0xb   : > { %v484_v23 = vld [vmem:[%s5200_s1 + $0x2a8] sm:$0xff] (!%p319_p2)  ;;  %2934 = vmatprep.subr.bf16.mxu0 (!%p319_p2), %v2933_v16  ;;  %2970 = vmatprep.subr.bf16.mxu1 (!%p319_p2), %v2969_v17  ;;  %v2971_v25 = vpack.c.bf16 (!%p319_p2), %v464_v22, %v443_v20  ;;  %v507_v28 = vld [vmem:[%s5200_s1 + $0x360] sm:$0xff] (!%p319_p2)  ;;  %v485_v32 = vld [vmem:[%s5200_s1 + $0x2b0] sm:$0xff] (!%p319_p2)  ;;  %v3593_v22 = vsub.s32 (!%p319_p2), 1, %v3562_v9 }
   0xc   : > { %v2937_v26 = vpack.c.bf16 (!%p319_p2), %v505_v24, %v484_v23  ;;  %v483_v29 = vld [vmem:[%s5200_s1 + $0x2a0] sm:$0xff] (!%p319_p2)  ;;  %v2973_v30 = vpack.c.bf16 (!%p319_p2), %v507_v28, %v486_v27  ;;  %v504_v31 = vld [vmem:[%s5200_s1 + $0x348] sm:$0xff] (!%p319_p2)  ;;  %v506_v33 = vld [vmem:[%s5200_s1 + $0x358] sm:$0xff] (!%p319_p2) }
   0xd   : > { %v2939_v34 = vpack.c.bf16 %v504_v31, %v483_v29  ;;  %v526_v35 = vld [vmem:[%s5200_s1 + $0x3f8] sm:$0xff]  ;;  %v547_v36 = vld [vmem:[%s5200_s1 + $0x4a0] sm:$0xff]  ;;  %v528_v37 = vld [vmem:[%s5200_s1 + $0x408] sm:$0xff]  ;;  %v2975_v38 = vpack.c.bf16 %v506_v33, %v485_v32  ;;  %s5211_s10 = smov (!%p3510_p3, %s2835_s10), 1 }
   0xe   : > { %2936 = vmatpush1.bf16.msra.mxu0 %v2935_v21  ;;  %2972 = vmatpush1.bf16.msra.mxu1 %v2971_v25  ;;  %v2941_v39 = vpack.c.bf16 %v547_v36, %v526_v35  ;;  %v549_v40 = vld [vmem:[%s5200_s1 + $0x4b0] sm:$0xff]  ;;  %v546_v42 = vld [vmem:[%s5200_s1 + $0x498] sm:$0xff]  ;;  %v527_v44 = vld [vmem:[%s5200_s1 + $0x400] sm:$0xff]  ;;  %s2840_s21 = sshll.u32 %s5211_s10, 1  ;;  %s3316_s20 = smul.u32 48, %s5211_s10 }
   0xf   : > { %2938 = vmatprep.subr.bf16.mxu0 %v2937_v26  ;;  %v525_v41 = vld [vmem:[%s5200_s1 + $0x3f0] sm:$0xff]  ;;  %2974 = vmatprep.subr.bf16.mxu1 %v2973_v30  ;;  %v2977_v43 = vpack.c.bf16 %v549_v40, %v528_v37  ;;  %v548_v45 = vld [vmem:[%s5200_s1 + $0x4a8] sm:$0xff]  ;;  %v570_v48 = vld [vmem:[%s5200_s1 + $0x558] sm:$0xff]  ;;  %s374_s17 = scalar_lea.vmem %s5199_s0, %s2840_s21  ;;  %s2843_s21 = sshll.u32 %s5211_s10, 2 }
  0x10   : > { %v568_v46 = vld [vmem:[%s5200_s1 + $0x548] sm:$0xff]  ;;  %v589_v47 = vld [vmem:[%s5200_s1 + $0x5f0] sm:$0xff]  ;;  %v591_v49 = vld [vmem:[%s5200_s1 + $0x600] sm:$0xff]  ;;  %v2943_v50 = vpack.c.bf16 %v546_v42, %v525_v41  ;;  %v2979_v51 = vpack.c.bf16 %v548_v45, %v527_v44  ;;  %s384_s24 = scalar_lea.vmem %s5203_s4, %s3316_s20  ;;  %s388_s28 = scalar_lea.vmem %s5205_s6, %s2843_s21 }
  0x11   : > { %v2945_v52 = vpack.c.bf16 %v589_v47, %v568_v46  ;;  %v567_v53 = vld [vmem:[%s5200_s1 + $0x540] sm:$0xff]  ;;  %v588_v54 = vld [vmem:[%s5200_s1 + $0x5e8] sm:$0xff]  ;;  %v569_v55 = vld [vmem:[%s5200_s1 + $0x550] sm:$0xff]  ;;  %v2981_v56 = vpack.c.bf16 %v591_v49, %v570_v48  ;;  %v3645_v49 = vsub.s32 0, %v3562_v9  ;;  %s379_s26 = scalar_lea.vmem %s5202_s3, %s3316_s20  ;;  %s397_s14 = scalar_lea.vmem %s5208_s9, %s2843_s21 }
  0x12   : > { %2940 = vmatpush1.bf16.msra.mxu0 %v2939_v34  ;;  %2976 = vmatpush1.bf16.msra.mxu1 %v2975_v38  ;;  %v590_v57 = vld [vmem:[%s5200_s1 + $0x5f8] sm:$0xff]  ;;  %v631_v59 = vld [vmem:[%s5200_s1 + $0x740] sm:$0xff]  ;;  %v612_v61 = vld [vmem:[%s5200_s1 + $0x6a8] sm:$0xff]  ;;  %v2947_v63 = vpack.c.bf16 %v588_v54, %v567_v53 }
  0x13   : > { %2942 = vmatprep.subr.bf16.mxu0 %v2941_v39  ;;  %2978 = vmatprep.subr.bf16.mxu1 %v2977_v43  ;;  %v610_v58 = vld [vmem:[%s5200_s1 + $0x698] sm:$0xff]  ;;  %v633_v62 = vld [vmem:[%s5200_s1 + $0x750] sm:$0xff]  ;;  %v2983_v0 = vpack.c.bf16 %v590_v57, %v569_v55  ;;  %v611_v4 = vld [vmem:[%s5200_s1 + $0x6a0] sm:$0xff] }
  0x14   : > { %v2949_v1 = vpack.c.bf16 %v631_v59, %v610_v58  ;;  %v609_v2 = vld [vmem:[%s5200_s1 + $0x690] sm:$0xff]  ;;  %v630_v3 = vld [vmem:[%s5200_s1 + $0x738] sm:$0xff]  ;;  %v2985_v5 = vpack.c.bf16 %v633_v62, %v612_v61  ;;  %v632_v6 = vld [vmem:[%s5200_s1 + $0x748] sm:$0xff] }
  0x15   : > { %v652_v7 = vld [vmem:[%s5200_s1 + $0x7e8] sm:$0xff]  ;;  %v673_v8 = vld [vmem:[%s5200_s1 + $0x890] sm:$0xff]  ;;  %v654_v10 = vld [vmem:[%s5200_s1 + $0x7f8] sm:$0xff]  ;;  %v2951_v12 = vpack.c.bf16 %v630_v3, %v609_v2  ;;  %v2987_v13 = vpack.c.bf16 %v632_v6, %v611_v4 }
  0x16   : > { %2944 = vmatpush1.bf16.msra.mxu0 %v2943_v50  ;;  %2980 = vmatpush1.bf16.msra.mxu1 %v2979_v51  ;;  %v675_v11 = vld [vmem:[%s5200_s1 + $0x8a0] sm:$0xff]  ;;  %v2953_v14 = vpack.c.bf16 %v673_v8, %v652_v7  ;;  %v672_v16 = vld [vmem:[%s5200_s1 + $0x888] sm:$0xff]  ;;  %v653_v17 = vld [vmem:[%s5200_s1 + $0x7f0] sm:$0xff] }
  0x17   : > { %2946 = vmatprep.subr.bf16.mxu0 %v2945_v52  ;;  %2982 = vmatprep.subr.bf16.mxu1 %v2981_v56  ;;  %v651_v15 = vld [vmem:[%s5200_s1 + $0x7e0] sm:$0xff]  ;;  %v2989_v18 = vpack.c.bf16 %v675_v11, %v654_v10  ;;  %v674_v19 = vld [vmem:[%s5200_s1 + $0x898] sm:$0xff]  ;;  %v696_v23 = vld [vmem:[%s5200_s1 + $0x948] sm:$0xff] }
  0x18   : > { %v694_v20 = vld [vmem:[%s5200_s1 + $0x938] sm:$0xff]  ;;  %v715_v21 = vld [vmem:[%s5200_s1 + $0x9e0] sm:$0xff]  ;;  %v717_v24 = vld [vmem:[%s5200_s1 + $0x9f0] sm:$0xff]  ;;  %v2955_v25 = vpack.c.bf16 %v672_v16, %v651_v15  ;;  %v2991_v27 = vpack.c.bf16 %v674_v19, %v653_v17 }
  0x19   : > { %v693_v26 = vld [vmem:[%s5200_s1 + $0x930] sm:$0xff]  ;;  %v2957_v28 = vpack.c.bf16 %v715_v21, %v694_v20  ;;  %v714_v29 = vld [vmem:[%s5200_s1 + $0x9d8] sm:$0xff]  ;;  %v695_v30 = vld [vmem:[%s5200_s1 + $0x940] sm:$0xff]  ;;  %v2993_v32 = vpack.c.bf16 %v717_v24, %v696_v23 }
  0x1a   : > { %2948 = vmatpush1.bf16.msra.mxu0 %v2947_v63  ;;  %2984 = vmatpush1.bf16.msra.mxu1 %v2983_v0  ;;  %v398_v31 = vld [vmem:[%s374_s17] sm:$0x3]  ;;  %v716_v33 = vld [vmem:[%s5200_s1 + $0x9e8] sm:$0xff]  ;;  %v757_v35 = vld [vmem:[%s5200_s1 + $0xb30] sm:$0xff]  ;;  %v2959_v39 = vpack.c.bf16 %v714_v29, %v693_v26 }
  0x1b   : > { %2950 = vmatprep.subr.bf16.mxu0 %v2949_v1  ;;  %2986 = vmatprep.subr.bf16.mxu1 %v2985_v5  ;;  %v736_v34 = vld [vmem:[%s5200_s1 + $0xa88] sm:$0xff]  ;;  %v3620_v36 = vrot.slane %v398_v31, %v3593_v22  ;;  %v738_v37 = vld [vmem:[%s5200_s1 + $0xa98] sm:$0xff]  ;;  %v759_v38 = vld [vmem:[%s5200_s1 + $0xb40] sm:$0xff]  ;;  %v2995_v40 = vpack.c.bf16 %v716_v33, %v695_v30  ;;  %v3679_v60 = vrot.slane %v398_v31, %v3645_v49 }
  0x1c   : > { %v2961_v41 = vpack.c.bf16 %v757_v35, %v736_v34  ;;  %v735_v42 = vld [vmem:[%s5200_s1 + $0xa80] sm:$0xff]  ;;  %v756_v43 = vld [vmem:[%s5200_s1 + $0xb28] sm:$0xff]  ;;  %v2997_v44 = vpack.c.bf16 %v759_v38, %v738_v37  ;;  %v737_v45 = vld [vmem:[%s5200_s1 + $0xa90] sm:$0xff] }
  0x1d   : > { %2848 = vmatprep.mubr.msk.f32.mxu0 %vm919_vm0, %v3620_v36  ;;  %v758_v46 = vld [vmem:[%s5200_s1 + $0xb38] sm:$0xff]  ;;  %2851 = vmatprep.mubr.msk.f32.mxu1 %vm919_vm0, %v3620_v36  ;;  %v2963_v47 = vpack.c.bf16 %v756_v43, %v735_v42  ;;  %v780_v51 = vld [vmem:[%s5200_s1 + $0xbe8] sm:$0x1]  ;;  %v777_v53 = vld [vmem:[%s5200_s1 + $0xbd0] sm:$0x1] }
  0x1e   : > { %2952 = vmatpush1.bf16.msra.mxu0 %v2951_v12  ;;  %2988 = vmatpush1.bf16.msra.mxu1 %v2987_v13  ;;  %v2999_v48 = vpack.c.bf16 %v758_v46, %v737_v45  ;;  %v778_v50 = vld [vmem:[%s5200_s1 + $0xbd8] sm:$0x1]  ;;  %v404_v52 = vld [vmem:[%s5200_s1 + $0x28] sm:$0xff]  ;;  %v425_v54 = vld [vmem:[%s5200_s1 + $0xd0] sm:$0xff] }
  0x1f   : > { %2954 = vmatprep.subr.bf16.mxu0 %v2953_v14  ;;  %2990 = vmatprep.subr.bf16.mxu1 %v2989_v18  ;;  %v406_v55 = vld [vmem:[%s5200_s1 + $0x38] sm:$0xff]  ;;  %v427_v56 = vld [vmem:[%s5200_s1 + $0xe0] sm:$0xff]  ;;  %v424_v58 = vld [vmem:[%s5200_s1 + $0xc8] sm:$0xff]  ;;  %v3001_v1 = vpack.c.bf16 %v425_v54, %v404_v52 }
  0x20   : > { %v403_v57 = vld [vmem:[%s5200_s1 + $0x20] sm:$0xff]  ;;  %v405_v59 = vld [vmem:[%s5200_s1 + $0x30] sm:$0xff]  ;;  %v426_v61 = vld [vmem:[%s5200_s1 + $0xd8] sm:$0xff]  ;;  %v3037_v2 = vpack.c.bf16 %v427_v56, %v406_v55 }
  0x21   : > { %v446_v62 = vld [vmem:[%s5200_s1 + $0x178] sm:$0xff]  ;;  %v467_v63 = vld [vmem:[%s5200_s1 + $0x220] sm:$0xff]  ;;  %v448_v3 = vld [vmem:[%s5200_s1 + $0x188] sm:$0xff]  ;;  %v3003_v5 = vpack.c.bf16 %v424_v58, %v403_v57  ;;  %v3039_v6 = vpack.c.bf16 %v426_v61, %v405_v59 }
  0x22   : > { %2956 = vmatpush1.bf16.msra.mxu0 %v2955_v25  ;;  %2992 = vmatpush1.bf16.msra.mxu1 %v2991_v27  ;;  %v779_v0 = vld [vmem:[%s5200_s1 + $0xbe0] sm:$0x1]  ;;  %v469_v4 = vld [vmem:[%s5200_s1 + $0x230] sm:$0xff]  ;;  %v3005_v7 = vpack.c.bf16 %v467_v63, %v446_v62  ;;  %v466_v10 = vld [vmem:[%s5200_s1 + $0x218] sm:$0xff] }
  0x23   : > { %2958 = vmatprep.subr.bf16.mxu0 %v2957_v28  ;;  %2994 = vmatprep.subr.bf16.mxu1 %v2993_v32  ;;  %v445_v8 = vld [vmem:[%s5200_s1 + $0x170] sm:$0xff]  ;;  %v447_v11 = vld [vmem:[%s5200_s1 + $0x180] sm:$0xff]  ;;  %v3041_v12 = vpack.c.bf16 %v469_v4, %v448_v3  ;;  %v468_v13 = vld [vmem:[%s5200_s1 + $0x228] sm:$0xff] }
  0x24   : > { %v488_v14 = vld [vmem:[%s5200_s1 + $0x2c8] sm:$0xff]  ;;  %v509_v15 = vld [vmem:[%s5200_s1 + $0x370] sm:$0xff]  ;;  %v490_v16 = vld [vmem:[%s5200_s1 + $0x2d8] sm:$0xff]  ;;  %v3007_v18 = vpack.c.bf16 %v466_v10, %v445_v8  ;;  %v3043_v19 = vpack.c.bf16 %v468_v13, %v447_v11 }
  0x25   : > { %v511_v17 = vld [vmem:[%s5200_s1 + $0x380] sm:$0xff]  ;;  %v3009_v20 = vpack.c.bf16 %v509_v15, %v488_v14  ;;  %v508_v23 = vld [vmem:[%s5200_s1 + $0x368] sm:$0xff]  ;;  %v489_v24 = vld [vmem:[%s5200_s1 + $0x2d0] sm:$0xff] }
  0x26   : > { %2960 = vmatpush1.bf16.msra.mxu0 %v2959_v39  ;;  %2996 = vmatpush1.bf16.msra.mxu1 %v2995_v40  ;;  %v487_v21 = vld [vmem:[%s5200_s1 + $0x2c0] sm:$0xff]  ;;  %v3045_v25 = vpack.c.bf16 %v511_v17, %v490_v16  ;;  %v510_v26 = vld [vmem:[%s5200_s1 + $0x378] sm:$0xff]  ;;  %v532_v29 = vld [vmem:[%s5200_s1 + $0x428] sm:$0xff] }
  0x27   : > { %2962 = vmatprep.subr.bf16.mxu0 %v2961_v41  ;;  %2998 = vmatprep.subr.bf16.mxu1 %v2997_v44  ;;  %v530_v27 = vld [vmem:[%s5200_s1 + $0x418] sm:$0xff]  ;;  %v551_v28 = vld [vmem:[%s5200_s1 + $0x4c0] sm:$0xff]  ;;  %v553_v30 = vld [vmem:[%s5200_s1 + $0x4d0] sm:$0xff]  ;;  %v3011_v31 = vpack.c.bf16 %v508_v23, %v487_v21  ;;  %v3047_v32 = vpack.c.bf16 %v510_v26, %v489_v24 }
  0x28   : > { %v3013_v33 = vpack.c.bf16 %v551_v28, %v530_v27  ;;  %v529_v34 = vld [vmem:[%s5200_s1 + $0x410] sm:$0xff]  ;;  %v550_v35 = vld [vmem:[%s5200_s1 + $0x4b8] sm:$0xff]  ;;  %v531_v37 = vld [vmem:[%s5200_s1 + $0x420] sm:$0xff]  ;;  %v3049_v38 = vpack.c.bf16 %v553_v30, %v532_v29 }
  0x29   : > { %v552_v39 = vld [vmem:[%s5200_s1 + $0x4c8] sm:$0xff]  ;;  %v593_v41 = vld [vmem:[%s5200_s1 + $0x610] sm:$0xff]  ;;  %v574_v42 = vld [vmem:[%s5200_s1 + $0x578] sm:$0xff]  ;;  %v3015_v44 = vpack.c.bf16 %v550_v35, %v529_v34 }
  0x2a   : > { %2964 = vmatpush1.bf16.msra.mxu0 %v2963_v47  ;;  %3000 = vmatpush1.bf16.msra.mxu1 %v2999_v48  ;;  %v572_v40 = vld [vmem:[%s5200_s1 + $0x568] sm:$0xff]  ;;  %v595_v43 = vld [vmem:[%s5200_s1 + $0x620] sm:$0xff]  ;;  %v3051_v45 = vpack.c.bf16 %v552_v39, %v531_v37  ;;  %v594_v52 = vld [vmem:[%s5200_s1 + $0x618] sm:$0xff] }
  0x2b   : > { %2846 = vmatprep.subr.msk.mxu0 %vm922_vm1, %v778_v50  ;;  %2849 = vmatprep.subr.msk.mxu1 %vm922_vm1, %v780_v51  ;;  %v3017_v46 = vpack.c.bf16 %v593_v41, %v572_v40  ;;  %v571_v47 = vld [vmem:[%s5200_s1 + $0x560] sm:$0xff]  ;;  %v592_v48 = vld [vmem:[%s5200_s1 + $0x608] sm:$0xff]  ;;  %v573_v50 = vld [vmem:[%s5200_s1 + $0x570] sm:$0xff]  ;;  %v3053_v51 = vpack.c.bf16 %v595_v43, %v574_v42 }
  0x2c   : > { %v635_v54 = vld [vmem:[%s5200_s1 + $0x760] sm:$0xff]  ;;  %v616_v55 = vld [vmem:[%s5200_s1 + $0x6c8] sm:$0xff]  ;;  %v637_v56 = vld [vmem:[%s5200_s1 + $0x770] sm:$0xff]  ;;  %v3019_v57 = vpack.c.bf16 %v592_v48, %v571_v47  ;;  %v3055_v58 = vpack.c.bf16 %v594_v52, %v573_v50 }
  0x2d   : > { %v613_v61 = vld [vmem:[%s5200_s1 + $0x6b0] sm:$0xff]  ;;  %v634_v62 = vld [vmem:[%s5200_s1 + $0x758] sm:$0xff]  ;;  %v615_v63 = vld [vmem:[%s5200_s1 + $0x6c0] sm:$0xff] }
  0x2e   : > { %2847 = vmatpush1.msk.msra.mxu0 %vm922_vm1, %v777_v53  ;;  %2850 = vmatpush1.msk.msra.mxu1 %vm922_vm1, %v779_v0  ;;  %v614_v53 = vld [vmem:[%s5200_s1 + $0x6b8] sm:$0xff]  ;;  %v3057_v0 = vpack.c.bf16 %v637_v56, %v616_v55  ;;  %v677_v3 = vld [vmem:[%s5200_s1 + $0x8b0] sm:$0xff]  ;;  %v655_v10 = vld [vmem:[%s5200_s1 + $0x800] sm:$0xff] }
  0x2f   : > { %1051 = vmatmul.mubr.f32.vlgmr.msra.gmra.mrb[0].mxu0 %v3679_v60  ;;  %3002 = vmatprep.subr.bf16.mxu0 %v3001_v1  ;;  %v3021_v59 = vpack.c.bf16 %v635_v54, %v614_v53  ;;  %v636_v1 = vld [vmem:[%s5200_s1 + $0x768] sm:$0xff]  ;;  %v658_v4 = vld [vmem:[%s5200_s1 + $0x818] sm:$0xff]  ;;  %v719_v16 = vld [vmem:[%s5200_s1 + $0xa00] sm:$0xff] }
  0x30   : > { %3038 = vmatprep.subr.bf16.mxu1 %v3037_v2  ;;  %1122 = vmatmul.mubr.f32.vlgmr.msra.gmra.mrb[0].mxu1 %v3679_v60  ;;  %v656_v2 = vld [vmem:[%s5200_s1 + $0x808] sm:$0xff]  ;;  %v678_v14 = vld [vmem:[%s5200_s1 + $0x8b8] sm:$0xff]  ;;  %v697_v23 = vld [vmem:[%s5200_s1 + $0x950] sm:$0xff] }
  0x31   : > { %3004 = vmatpush1.bf16.msra.mxu0 %v3003_v5  ;;  %3040 = vmatpush1.bf16.msra.mxu1 %v3039_v6  ;;  %v679_v5 = vld [vmem:[%s5200_s1 + $0x8c0] sm:$0xff]  ;;  %v3023_v6 = vpack.c.bf16 %v634_v62, %v613_v61  ;;  %v3025_v8 = vpack.c.bf16 %v677_v3, %v656_v2  ;;  %v676_v11 = vld [vmem:[%s5200_s1 + $0x8a8] sm:$0xff]  ;;  %v698_v15 = vld [vmem:[%s5200_s1 + $0x958] sm:$0xff] }
  0x32   : > { %3006 = vmatprep.subr.bf16.mxu0 %v3005_v7  ;;  %3042 = vmatprep.subr.bf16.mxu1 %v3041_v12  ;;  %v3059_v7 = vpack.c.bf16 %v636_v1, %v615_v63  ;;  %v657_v12 = vld [vmem:[%s5200_s1 + $0x810] sm:$0xff]  ;;  %v3061_v13 = vpack.c.bf16 %v679_v5, %v658_v4  ;;  %v700_v17 = vld [vmem:[%s5200_s1 + $0x968] sm:$0xff]  ;;  %v3029_v21 = vpack.c.bf16 %v719_v16, %v698_v15  ;;  %v718_v24 = vld [vmem:[%s5200_s1 + $0x9f8] sm:$0xff] }
  0x33   : > { %2854 = vmatprep.mubr.msk.f32.mxu0 %vm919_vm0, %v3620_v36  ;;  %2857 = vmatprep.mubr.msk.f32.mxu1 %vm919_vm0, %v3620_v36  ;;  %v720_v27 = vld [vmem:[%s5200_s1 + $0xa08] sm:$0xff]  ;;  %v761_v29 = vld [vmem:[%s5200_s1 + $0xb50] sm:$0xff]  ;;  %v742_v30 = vld [vmem:[%s5200_s1 + $0xab8] sm:$0xff] }
  0x34   : > { %v740_v28 = vld [vmem:[%s5200_s1 + $0xaa8] sm:$0xff]  ;;  %v739_v35 = vld [vmem:[%s5200_s1 + $0xaa0] sm:$0xff]  ;;  %v741_v39 = vld [vmem:[%s5200_s1 + $0xab0] sm:$0xff] }
  0x35   : > { %3008 = vmatpush1.bf16.msra.mxu0 %v3007_v18  ;;  %3044 = vmatpush1.bf16.msra.mxu1 %v3043_v19  ;;  %v721_v18 = vld [vmem:[%s5200_s1 + $0xa10] sm:$0xff]  ;;  %v3027_v19 = vpack.c.bf16 %v676_v11, %v655_v10  ;;  %v3033_v34 = vpack.c.bf16 %v761_v29, %v740_v28  ;;  %v760_v37 = vld [vmem:[%s5200_s1 + $0xb48] sm:$0xff]  ;;  %v762_v40 = vld [vmem:[%s5200_s1 + $0xb58] sm:$0xff] }
  0x36   : > { %3010 = vmatprep.subr.bf16.mxu0 %v3009_v20  ;;  %3046 = vmatprep.subr.bf16.mxu1 %v3045_v25  ;;  %v3063_v20 = vpack.c.bf16 %v678_v14, %v657_v12  ;;  %v699_v25 = vld [vmem:[%s5200_s1 + $0x960] sm:$0xff]  ;;  %v3065_v26 = vpack.c.bf16 %v721_v18, %v700_v17  ;;  %v3035_v41 = vpack.c.bf16 %v760_v37, %v739_v35  ;;  %v782_v43 = vld [vmem:[%s5200_s1 + $0xbf8] sm:$0x1]  ;;  %v429_v47 = vld [vmem:[%s5200_s1 + $0xf0] sm:$0xff] }
  0x37   : > { %v3071_v42 = vpack.c.bf16 %v762_v40, %v741_v39  ;;  %v410_v48 = vld [vmem:[%s5200_s1 + $0x58] sm:$0xff]  ;;  %v431_v50 = vld [vmem:[%s5200_s1 + $0x100] sm:$0xff]  ;;  %v428_v52 = vld [vmem:[%s5200_s1 + $0xe8] sm:$0xff] }
  0x38   : > { %v409_v53 = vld [vmem:[%s5200_s1 + $0x50] sm:$0xff]  ;;  %v430_v54 = vld [vmem:[%s5200_s1 + $0xf8] sm:$0xff]  ;;  %v471_v56 = vld [vmem:[%s5200_s1 + $0x240] sm:$0xff]  ;;  %v3109_v62 = vpack.c.bf16 %v431_v50, %v410_v48 }
  0x39   : > { %3012 = vmatpush1.bf16.msra.mxu0 %v3011_v31  ;;  %3048 = vmatpush1.bf16.msra.mxu1 %v3047_v32  ;;  %v763_v31 = vld [vmem:[%s5200_s1 + $0xb60] sm:$0xff]  ;;  %v3031_v32 = vpack.c.bf16 %v718_v24, %v697_v23  ;;  %v450_v55 = vld [vmem:[%s5200_s1 + $0x198] sm:$0xff]  ;;  %v473_v61 = vld [vmem:[%s5200_s1 + $0x250] sm:$0xff] }
  0x3a   : > { %3014 = vmatprep.subr.bf16.mxu0 %v3013_v33  ;;  %3050 = vmatprep.subr.bf16.mxu1 %v3049_v38  ;;  %v3067_v33 = vpack.c.bf16 %v720_v27, %v699_v25  ;;  %v3069_v38 = vpack.c.bf16 %v763_v31, %v742_v30  ;;  %v3077_v1 = vpack.c.bf16 %v471_v56, %v450_v55  ;;  %v449_v2 = vld [vmem:[%s5200_s1 + $0x190] sm:$0xff]  ;;  %v470_v3 = vld [vmem:[%s5200_s1 + $0x238] sm:$0xff]  ;;  %v451_v4 = vld [vmem:[%s5200_s1 + $0x1a0] sm:$0xff] }
  0x3b   : > { %v494_v10 = vld [vmem:[%s5200_s1 + $0x2f8] sm:$0xff]  ;;  %v515_v11 = vld [vmem:[%s5200_s1 + $0x3a0] sm:$0xff]  ;;  %v3079_v12 = vpack.c.bf16 %v470_v3, %v449_v2  ;;  %v512_v16 = vld [vmem:[%s5200_s1 + $0x388] sm:$0xff] }
  0x3c   : > { %v491_v15 = vld [vmem:[%s5200_s1 + $0x2e0] sm:$0xff]  ;;  %v493_v17 = vld [vmem:[%s5200_s1 + $0x2f0] sm:$0xff]  ;;  %v3117_v18 = vpack.c.bf16 %v515_v11, %v494_v10  ;;  %v536_v23 = vld [vmem:[%s5200_s1 + $0x448] sm:$0xff] }
  0x3d   : > { %3016 = vmatpush1.bf16.msra.mxu0 %v3015_v44  ;;  %3052 = vmatpush1.bf16.msra.mxu1 %v3051_v45  ;;  %v784_v44 = vld [vmem:[%s5200_s1 + $0xc08] sm:$0x1]  ;;  %v557_v24 = vld [vmem:[%s5200_s1 + $0x4f0] sm:$0xff]  ;;  %v3083_v25 = vpack.c.bf16 %v512_v16, %v491_v15  ;;  %v554_v29 = vld [vmem:[%s5200_s1 + $0x4d8] sm:$0xff] }
  0x3e   : > { %3018 = vmatprep.subr.bf16.mxu0 %v3017_v46  ;;  %3054 = vmatprep.subr.bf16.mxu1 %v3053_v51  ;;  %v408_v45 = vld [vmem:[%s5200_s1 + $0x48] sm:$0xff]  ;;  %v781_v46 = vld [vmem:[%s5200_s1 + $0xbf0] sm:$0x1]  ;;  %v407_v51 = vld [vmem:[%s5200_s1 + $0x40] sm:$0xff]  ;;  %v3121_v31 = vpack.c.bf16 %v557_v24, %v536_v23 }
  0x3f   : > { %v3075_v63 = vpack.c.bf16 %v428_v52, %v407_v51  ;;  %v533_v28 = vld [vmem:[%s5200_s1 + $0x430] sm:$0xff]  ;;  %v535_v30 = vld [vmem:[%s5200_s1 + $0x440] sm:$0xff]  ;;  %v578_v35 = vld [vmem:[%s5200_s1 + $0x598] sm:$0xff] }
  0x40   : > { %v599_v37 = vld [vmem:[%s5200_s1 + $0x640] sm:$0xff]  ;;  %v620_v48 = vld [vmem:[%s5200_s1 + $0x6e8] sm:$0xff]  ;;  %v641_v50 = vld [vmem:[%s5200_s1 + $0x790] sm:$0xff] }
  0x41   : > { %3020 = vmatpush1.bf16.msra.mxu0 %v3019_v57  ;;  %3056 = vmatpush1.bf16.msra.mxu1 %v3055_v58  ;;  %v783_v57 = vld [vmem:[%s5200_s1 + $0xc00] sm:$0x1]  ;;  %v3073_v58 = vpack.c.bf16 %v429_v47, %v408_v45  ;;  %v598_v45 = vld [vmem:[%s5200_s1 + $0x638] sm:$0xff]  ;;  %v704_v11 = vld [vmem:[%s5200_s1 + $0x988] sm:$0xff] }
  0x42   : > { %3022 = vmatprep.subr.bf16.mxu0 %v3021_v59  ;;  %3058 = vmatprep.subr.bf16.mxu1 %v3057_v0  ;;  %v452_v59 = vld [vmem:[%s5200_s1 + $0x1a8] sm:$0xff]  ;;  %v3111_v0 = vpack.c.bf16 %v430_v54, %v409_v53  ;;  %v639_v47 = vld [vmem:[%s5200_s1 + $0x780] sm:$0xff]  ;;  %v617_v54 = vld [vmem:[%s5200_s1 + $0x6d0] sm:$0xff] }
  0x43   : > { %v3113_v5 = vpack.c.bf16 %v473_v61, %v452_v59  ;;  %v638_v55 = vld [vmem:[%s5200_s1 + $0x778] sm:$0xff]  ;;  %v619_v56 = vld [vmem:[%s5200_s1 + $0x6e0] sm:$0xff]  ;;  %v660_v59 = vld [vmem:[%s5200_s1 + $0x828] sm:$0xff] }
  0x44   : > { %v681_v61 = vld [vmem:[%s5200_s1 + $0x8d0] sm:$0xff]  ;;  %v659_v3 = vld [vmem:[%s5200_s1 + $0x820] sm:$0xff]  ;;  %v746_v24 = vld [vmem:[%s5200_s1 + $0xad8] sm:$0xff] }
  0x45   : > { %3024 = vmatpush1.bf16.msra.mxu0 %v3023_v6  ;;  %3060 = vmatpush1.bf16.msra.mxu1 %v3059_v7  ;;  %v472_v6 = vld [vmem:[%s5200_s1 + $0x248] sm:$0xff]  ;;  %v3097_v2 = vpack.c.bf16 %v681_v61, %v660_v59  ;;  %v723_v10 = vld [vmem:[%s5200_s1 + $0xa20] sm:$0xff]  ;;  %v701_v16 = vld [vmem:[%s5200_s1 + $0x970] sm:$0xff] }
  0x46   : > { %3026 = vmatprep.subr.bf16.mxu0 %v3025_v8  ;;  %3062 = vmatprep.subr.bf16.mxu1 %v3061_v13  ;;  %v492_v7 = vld [vmem:[%s5200_s1 + $0x2e8] sm:$0xff]  ;;  %v513_v8 = vld [vmem:[%s5200_s1 + $0x390] sm:$0xff]  ;;  %v3115_v13 = vpack.c.bf16 %v472_v6, %v451_v4  ;;  %v474_v61 = vld [vmem:[%s5200_s1 + $0x258] sm:$0xff] }
  0x47   : > { %v3081_v14 = vpack.c.bf16 %v513_v8, %v492_v7  ;;  %v680_v4 = vld [vmem:[%s5200_s1 + $0x8c8] sm:$0xff]  ;;  %v682_v7 = vld [vmem:[%s5200_s1 + $0x8d8] sm:$0xff]  ;;  %v765_v23 = vld [vmem:[%s5200_s1 + $0xb70] sm:$0xff] }
  0x48   : > { %v702_v8 = vld [vmem:[%s5200_s1 + $0x978] sm:$0xff]  ;;  %v453_v59 = vld [vmem:[%s5200_s1 + $0x1b0] sm:$0xff] }
  0x49   : > { %3028 = vmatpush1.bf16.msra.mxu0 %v3027_v19  ;;  %3064 = vmatpush1.bf16.msra.mxu1 %v3063_v20  ;;  %v514_v19 = vld [vmem:[%s5200_s1 + $0x398] sm:$0xff]  ;;  %v3101_v15 = vpack.c.bf16 %v723_v10, %v702_v8  ;;  %v495_v8 = vld [vmem:[%s5200_s1 + $0x300] sm:$0xff]  ;;  %v516_v10 = vld [vmem:[%s5200_s1 + $0x3a8] sm:$0xff] }
  0x4a   : > { %3030 = vmatprep.subr.bf16.mxu0 %v3029_v21  ;;  %3066 = vmatprep.subr.bf16.mxu1 %v3065_v26  ;;  %v534_v20 = vld [vmem:[%s5200_s1 + $0x438] sm:$0xff]  ;;  %v555_v21 = vld [vmem:[%s5200_s1 + $0x4e0] sm:$0xff]  ;;  %v3119_v26 = vpack.c.bf16 %v514_v19, %v493_v17 }
  0x4b   : > { %v3085_v27 = vpack.c.bf16 %v555_v21, %v534_v20  ;;  %v722_v17 = vld [vmem:[%s5200_s1 + $0xa18] sm:$0xff]  ;;  %v724_v20 = vld [vmem:[%s5200_s1 + $0xa28] sm:$0xff] }
  0x4c   : > { %v744_v21 = vld [vmem:[%s5200_s1 + $0xac8] sm:$0xff] }
  0x4d   : > { %3032 = vmatpush1.bf16.msra.mxu0 %v3031_v32  ;;  %3068 = vmatpush1.bf16.msra.mxu1 %v3067_v33  ;;  %v556_v32 = vld [vmem:[%s5200_s1 + $0x4e8] sm:$0xff] }
  0x4e   : > { %3034 = vmatprep.subr.bf16.mxu0 %v3033_v34  ;;  %3070 = vmatprep.subr.bf16.mxu1 %v3069_v38  ;;  %v576_v33 = vld [vmem:[%s5200_s1 + $0x588] sm:$0xff]  ;;  %v597_v34 = vld [vmem:[%s5200_s1 + $0x630] sm:$0xff]  ;;  %v3087_v38 = vpack.c.bf16 %v554_v29, %v533_v28  ;;  %v3123_v39 = vpack.c.bf16 %v556_v32, %v535_v30  ;;  %v3105_v28 = vpack.c.bf16 %v765_v23, %v744_v21  ;;  %v743_v29 = vld [vmem:[%s5200_s1 + $0xac0] sm:$0xff] }
  0x4f   : > { %v3089_v40 = vpack.c.bf16 %v597_v34, %v576_v33  ;;  %v764_v30 = vld [vmem:[%s5200_s1 + $0xb68] sm:$0xff]  ;;  %v745_v32 = vld [vmem:[%s5200_s1 + $0xad0] sm:$0xff]  ;;  %v766_v33 = vld [vmem:[%s5200_s1 + $0xb78] sm:$0xff] }
  0x50   : > { %v3107_v34 = vpack.c.bf16 %v764_v30, %v743_v29  ;;  %v537_v21 = vld [vmem:[%s5200_s1 + $0x450] sm:$0xff]  ;;  %v558_v23 = vld [vmem:[%s5200_s1 + $0x4f8] sm:$0xff]  ;;  %v603_v30 = vld [vmem:[%s5200_s1 + $0x660] sm:$0xff] }
  0x51   : > { %3036 = vmatpush1.bf16.msra.mxu0 %v3035_v41  ;;  %3072 = vmatpush1.bf16.msra.mxu1 %v3071_v42  ;;  %v575_v41 = vld [vmem:[%s5200_s1 + $0x580] sm:$0xff]  ;;  %v596_v42 = vld [vmem:[%s5200_s1 + $0x628] sm:$0xff]  ;;  %v582_v29 = vld [vmem:[%s5200_s1 + $0x5b8] sm:$0xff] }
  0x52   : > { %2852 = vmatprep.subr.msk.mxu0 %vm922_vm1, %v782_v43  ;;  %2855 = vmatprep.subr.msk.mxu1 %vm922_vm1, %v784_v44  ;;  %v577_v43 = vld [vmem:[%s5200_s1 + $0x590] sm:$0xff]  ;;  %v3125_v44 = vpack.c.bf16 %v599_v37, %v578_v35  ;;  %v3091_v51 = vpack.c.bf16 %v596_v42, %v575_v41  ;;  %v3143_v35 = vpack.c.bf16 %v766_v33, %v745_v32  ;;  %v786_v37 = vld [vmem:[%s5200_s1 + $0xc18] sm:$0x1] }
  0x53   : > { %v3127_v52 = vpack.c.bf16 %v598_v45, %v577_v43  ;;  %v433_v41 = vld [vmem:[%s5200_s1 + $0x110] sm:$0xff]  ;;  %v414_v42 = vld [vmem:[%s5200_s1 + $0x78] sm:$0xff]  ;;  %v435_v43 = vld [vmem:[%s5200_s1 + $0x120] sm:$0xff] }
  0x54   : > { %v432_v45 = vld [vmem:[%s5200_s1 + $0x108] sm:$0xff] }
  0x55   : > { %2853 = vmatpush1.msk.msra.mxu0 %vm922_vm1, %v781_v46  ;;  %2856 = vmatpush1.msk.msra.mxu1 %vm922_vm1, %v783_v57  ;;  %v618_v46 = vld [vmem:[%s5200_s1 + $0x6d8] sm:$0xff]  ;;  %v3129_v57 = vpack.c.bf16 %v641_v50, %v620_v48  ;;  %v475_v50 = vld [vmem:[%s5200_s1 + $0x260] sm:$0xff] }
  0x56   : > { %1193 = vmatmul.mubr.f32.vlgmr.msra.gmra.mrb[2].mxu0 %v3679_v60  ;;  %1264 = vmatmul.mubr.f32.vlgmr.msra.gmra.mrb[2].mxu1 %v3679_v60  ;;  %v3093_v53 = vpack.c.bf16 %v639_v47, %v618_v46  ;;  %v413_v46 = vld [vmem:[%s5200_s1 + $0x70] sm:$0xff]  ;;  %v434_v47 = vld [vmem:[%s5200_s1 + $0x118] sm:$0xff] }
  0x57   : > { %3074 = vmatprep.subr.bf16.mxu0 %v3073_v58  ;;  %3110 = vmatprep.subr.bf16.mxu1 %v3109_v62  ;;  %v640_v58 = vld [vmem:[%s5200_s1 + $0x788] sm:$0xff]  ;;  %v662_v62 = vld [vmem:[%s5200_s1 + $0x838] sm:$0xff] }
  0x58   : > { %3076 = vmatpush1.bf16.msra.mxu0 %v3075_v63  ;;  %3112 = vmatpush1.bf16.msra.mxu1 %v3111_v0  ;;  %v683_v63 = vld [vmem:[%s5200_s1 + $0x8e0] sm:$0xff]  ;;  %v3095_v0 = vpack.c.bf16 %v638_v55, %v617_v54  ;;  %v454_v48 = vld [vmem:[%s5200_s1 + $0x1b8] sm:$0xff]  ;;  %v477_v54 = vld [vmem:[%s5200_s1 + $0x270] sm:$0xff]  ;;  %v3181_v55 = vpack.c.bf16 %v435_v43, %v414_v42 }
  0x59   : > { %3078 = vmatprep.subr.bf16.mxu0 %v3077_v1  ;;  %3114 = vmatprep.subr.bf16.mxu1 %v3113_v5  ;;  %v3131_v1 = vpack.c.bf16 %v640_v58, %v619_v56  ;;  %v661_v5 = vld [vmem:[%s5200_s1 + $0x830] sm:$0xff]  ;;  %v3133_v6 = vpack.c.bf16 %v683_v63, %v662_v62  ;;  %v3149_v58 = vpack.c.bf16 %v475_v50, %v454_v48  ;;  %v455_v62 = vld [vmem:[%s5200_s1 + $0x1c0] sm:$0xff]  ;;  %v624_v42 = vld [vmem:[%s5200_s1 + $0x708] sm:$0xff] }
  0x5a   : > { %2860 = vmatprep.mubr.msk.f32.mxu0 %vm919_vm0, %v3620_v36  ;;  %2863 = vmatprep.mubr.msk.f32.mxu1 %vm919_vm0, %v3620_v36  ;;  %v645_v43 = vld [vmem:[%s5200_s1 + $0x7b0] sm:$0xff]  ;;  %v642_v48 = vld [vmem:[%s5200_s1 + $0x798] sm:$0xff]  ;;  %v623_v50 = vld [vmem:[%s5200_s1 + $0x700] sm:$0xff] }
  0x5c   : > { %3080 = vmatpush1.bf16.msra.mxu0 %v3079_v12  ;;  %3116 = vmatpush1.bf16.msra.mxu1 %v3115_v13  ;;  %v725_v12 = vld [vmem:[%s5200_s1 + $0xa30] sm:$0xff]  ;;  %v3099_v13 = vpack.c.bf16 %v680_v4, %v659_v3  ;;  %v498_v3 = vld [vmem:[%s5200_s1 + $0x318] sm:$0xff]  ;;  %v519_v4 = vld [vmem:[%s5200_s1 + $0x3c0] sm:$0xff] }
  0x5d   : > { %3082 = vmatprep.subr.bf16.mxu0 %v3081_v14  ;;  %3118 = vmatprep.subr.bf16.mxu1 %v3117_v18  ;;  %v3135_v14 = vpack.c.bf16 %v682_v7, %v661_v5  ;;  %v703_v18 = vld [vmem:[%s5200_s1 + $0x980] sm:$0xff]  ;;  %v3137_v19 = vpack.c.bf16 %v725_v12, %v704_v11  ;;  %v3151_v5 = vpack.c.bf16 %v474_v61, %v453_v59  ;;  %v497_v11 = vld [vmem:[%s5200_s1 + $0x310] sm:$0xff] }
  0x5e   : > { %v3189_v12 = vpack.c.bf16 %v519_v4, %v498_v3  ;;  %v663_v61 = vld [vmem:[%s5200_s1 + $0x840] sm:$0xff]  ;;  %v708_v4 = vld [vmem:[%s5200_s1 + $0x9a8] sm:$0xff] }
  0x5f   : > { %v727_v3 = vld [vmem:[%s5200_s1 + $0xa40] sm:$0xff] }
  0x60   : > { %3084 = vmatpush1.bf16.msra.mxu0 %v3083_v25  ;;  %3120 = vmatpush1.bf16.msra.mxu1 %v3119_v26  ;;  %v767_v25 = vld [vmem:[%s5200_s1 + $0xb80] sm:$0xff]  ;;  %v3103_v26 = vpack.c.bf16 %v722_v17, %v701_v16  ;;  %v540_v16 = vld [vmem:[%s5200_s1 + $0x468] sm:$0xff]  ;;  %v561_v17 = vld [vmem:[%s5200_s1 + $0x510] sm:$0xff] }
  0x61   : > { %3086 = vmatprep.subr.bf16.mxu0 %v3085_v27  ;;  %3122 = vmatprep.subr.bf16.mxu1 %v3121_v31  ;;  %v3139_v27 = vpack.c.bf16 %v724_v20, %v703_v18  ;;  %v3141_v31 = vpack.c.bf16 %v767_v25, %v746_v24  ;;  %v3155_v18 = vpack.c.bf16 %v516_v10, %v495_v8  ;;  %v539_v24 = vld [vmem:[%s5200_s1 + $0x460] sm:$0xff]  ;;  %v705_v10 = vld [vmem:[%s5200_s1 + $0x990] sm:$0xff] }
  0x62   : > { %v3193_v25 = vpack.c.bf16 %v561_v17, %v540_v16  ;;  %v769_v16 = vld [vmem:[%s5200_s1 + $0xb90] sm:$0xff]  ;;  %v750_v17 = vld [vmem:[%s5200_s1 + $0xaf8] sm:$0xff] }
  0x64   : > { %3088 = vmatpush1.bf16.msra.mxu0 %v3087_v38  ;;  %3124 = vmatpush1.bf16.msra.mxu1 %v3123_v39  ;;  %v788_v38 = vld [vmem:[%s5200_s1 + $0xc28] sm:$0x1] }
  0x65   : > { %3090 = vmatprep.subr.bf16.mxu0 %v3089_v40  ;;  %3126 = vmatprep.subr.bf16.mxu1 %v3125_v44  ;;  %v412_v39 = vld [vmem:[%s5200_s1 + $0x68] sm:$0xff]  ;;  %v785_v40 = vld [vmem:[%s5200_s1 + $0xc10] sm:$0x1]  ;;  %v411_v44 = vld [vmem:[%s5200_s1 + $0x60] sm:$0xff] }
  0x66   : > { %v3147_v56 = vpack.c.bf16 %v432_v45, %v411_v44 }
  0x68   : > { %3092 = vmatpush1.bf16.msra.mxu0 %v3091_v51  ;;  %3128 = vmatpush1.bf16.msra.mxu1 %v3127_v52  ;;  %v787_v51 = vld [vmem:[%s5200_s1 + $0xc20] sm:$0x1]  ;;  %v3145_v52 = vpack.c.bf16 %v433_v41, %v412_v39  ;;  %v602_v39 = vld [vmem:[%s5200_s1 + $0x658] sm:$0xff] }
  0x69   : > { %3094 = vmatprep.subr.bf16.mxu0 %v3093_v53  ;;  %3130 = vmatprep.subr.bf16.mxu1 %v3129_v57  ;;  %v456_v53 = vld [vmem:[%s5200_s1 + $0x1c8] sm:$0xff]  ;;  %v3183_v57 = vpack.c.bf16 %v434_v47, %v413_v46  ;;  %v643_v41 = vld [vmem:[%s5200_s1 + $0x7a0] sm:$0xff]  ;;  %v621_v47 = vld [vmem:[%s5200_s1 + $0x6f0] sm:$0xff] }
  0x6a   : > { %v3185_v63 = vpack.c.bf16 %v477_v54, %v456_v53  ;;  %v664_v53 = vld [vmem:[%s5200_s1 + $0x848] sm:$0xff]  ;;  %v685_v54 = vld [vmem:[%s5200_s1 + $0x8f0] sm:$0xff] }
  0x6b   : > { %v3169_v59 = vpack.c.bf16 %v685_v54, %v664_v53  ;;  %v457_v53 = vld [vmem:[%s5200_s1 + $0x1d0] sm:$0xff]  ;;  %v478_v54 = vld [vmem:[%s5200_s1 + $0x278] sm:$0xff] }
  0x6c   : > { %3096 = vmatpush1.bf16.msra.mxu0 %v3095_v0  ;;  %3132 = vmatpush1.bf16.msra.mxu1 %v3131_v1  ;;  %v476_v0 = vld [vmem:[%s5200_s1 + $0x268] sm:$0xff] }
  0x6d   : > { %3098 = vmatprep.subr.bf16.mxu0 %v3097_v2  ;;  %3134 = vmatprep.subr.bf16.mxu1 %v3133_v6  ;;  %v496_v1 = vld [vmem:[%s5200_s1 + $0x308] sm:$0xff]  ;;  %v517_v2 = vld [vmem:[%s5200_s1 + $0x3b0] sm:$0xff]  ;;  %v3187_v6 = vpack.c.bf16 %v476_v0, %v455_v62 }
  0x6e   : > { %v3153_v7 = vpack.c.bf16 %v517_v2, %v496_v1  ;;  %v684_v62 = vld [vmem:[%s5200_s1 + $0x8e8] sm:$0xff]  ;;  %v686_v1 = vld [vmem:[%s5200_s1 + $0x8f8] sm:$0xff] }
  0x6f   : > { %v706_v2 = vld [vmem:[%s5200_s1 + $0x998] sm:$0xff] }
  0x70   : > { %3100 = vmatpush1.bf16.msra.mxu0 %v3099_v13  ;;  %3136 = vmatpush1.bf16.msra.mxu1 %v3135_v14  ;;  %v518_v13 = vld [vmem:[%s5200_s1 + $0x3b8] sm:$0xff]  ;;  %v3173_v8 = vpack.c.bf16 %v727_v3, %v706_v2  ;;  %v499_v2 = vld [vmem:[%s5200_s1 + $0x320] sm:$0xff]  ;;  %v520_v3 = vld [vmem:[%s5200_s1 + $0x3c8] sm:$0xff] }
  0x71   : > { %3102 = vmatprep.subr.bf16.mxu0 %v3101_v15  ;;  %3138 = vmatprep.subr.bf16.mxu1 %v3137_v19  ;;  %v538_v14 = vld [vmem:[%s5200_s1 + $0x458] sm:$0xff]  ;;  %v559_v15 = vld [vmem:[%s5200_s1 + $0x500] sm:$0xff]  ;;  %v3191_v19 = vpack.c.bf16 %v518_v13, %v497_v11 }
  0x72   : > { %v3157_v20 = vpack.c.bf16 %v559_v15, %v538_v14  ;;  %v726_v11 = vld [vmem:[%s5200_s1 + $0xa38] sm:$0xff]  ;;  %v728_v14 = vld [vmem:[%s5200_s1 + $0xa48] sm:$0xff] }
  0x73   : > { %v748_v15 = vld [vmem:[%s5200_s1 + $0xae8] sm:$0xff] }
  0x74   : > { %3104 = vmatpush1.bf16.msra.mxu0 %v3103_v26  ;;  %3140 = vmatpush1.bf16.msra.mxu1 %v3139_v27  ;;  %v560_v26 = vld [vmem:[%s5200_s1 + $0x508] sm:$0xff] }
  0x75   : > { %3106 = vmatprep.subr.bf16.mxu0 %v3105_v28  ;;  %3142 = vmatprep.subr.bf16.mxu1 %v3141_v31  ;;  %v580_v27 = vld [vmem:[%s5200_s1 + $0x5a8] sm:$0xff]  ;;  %v601_v28 = vld [vmem:[%s5200_s1 + $0x650] sm:$0xff]  ;;  %v3159_v31 = vpack.c.bf16 %v558_v23, %v537_v21  ;;  %v3195_v32 = vpack.c.bf16 %v560_v26, %v539_v24  ;;  %v3177_v21 = vpack.c.bf16 %v769_v16, %v748_v15  ;;  %v747_v23 = vld [vmem:[%s5200_s1 + $0xae0] sm:$0xff] }
  0x76   : > { %v3161_v33 = vpack.c.bf16 %v601_v28, %v580_v27  ;;  %v768_v24 = vld [vmem:[%s5200_s1 + $0xb88] sm:$0xff]  ;;  %v749_v26 = vld [vmem:[%s5200_s1 + $0xaf0] sm:$0xff]  ;;  %v770_v27 = vld [vmem:[%s5200_s1 + $0xb98] sm:$0xff] }
  0x77   : > { %v3179_v28 = vpack.c.bf16 %v768_v24, %v747_v23  ;;  %v541_v15 = vld [vmem:[%s5200_s1 + $0x470] sm:$0xff]  ;;  %v562_v16 = vld [vmem:[%s5200_s1 + $0x518] sm:$0xff]  ;;  %v607_v24 = vld [vmem:[%s5200_s1 + $0x680] sm:$0xff] }
  0x78   : > { %3108 = vmatpush1.bf16.msra.mxu0 %v3107_v34  ;;  %3144 = vmatpush1.bf16.msra.mxu1 %v3143_v35  ;;  %v579_v34 = vld [vmem:[%s5200_s1 + $0x5a0] sm:$0xff]  ;;  %v600_v35 = vld [vmem:[%s5200_s1 + $0x648] sm:$0xff]  ;;  %v586_v23 = vld [vmem:[%s5200_s1 + $0x5d8] sm:$0xff] }
  0x79   : > { %2858 = vmatprep.subr.msk.mxu0 %vm922_vm1, %v786_v37  ;;  %2861 = vmatprep.subr.msk.mxu1 %vm922_vm1, %v788_v38  ;;  %v581_v37 = vld [vmem:[%s5200_s1 + $0x5b0] sm:$0xff]  ;;  %v3197_v38 = vpack.c.bf16 %v603_v30, %v582_v29  ;;  %v3163_v44 = vpack.c.bf16 %v600_v35, %v579_v34  ;;  %v3215_v29 = vpack.c.bf16 %v770_v27, %v749_v26  ;;  %v790_v30 = vld [vmem:[%s5200_s1 + $0xc38] sm:$0x1] }
  0x7a   : > { %v3199_v45 = vpack.c.bf16 %v602_v39, %v581_v37  ;;  %v437_v34 = vld [vmem:[%s5200_s1 + $0x130] sm:$0xff]  ;;  %v418_v35 = vld [vmem:[%s5200_s1 + $0x98] sm:$0xff]  ;;  %v439_v37 = vld [vmem:[%s5200_s1 + $0x140] sm:$0xff] }
  0x7b   : > { %v436_v39 = vld [vmem:[%s5200_s1 + $0x128] sm:$0xff] }
  0x7c   : > { %2859 = vmatpush1.msk.msra.mxu0 %vm922_vm1, %v785_v40  ;;  %2862 = vmatpush1.msk.msra.mxu1 %vm922_vm1, %v787_v51  ;;  %v622_v40 = vld [vmem:[%s5200_s1 + $0x6f8] sm:$0xff]  ;;  %v3201_v51 = vpack.c.bf16 %v645_v43, %v624_v42  ;;  %v479_v43 = vld [vmem:[%s5200_s1 + $0x280] sm:$0xff] }
  0x7d   : > { %1335 = vmatmul.mubr.f32.vlgmr.msra.gmra.mrb[4].mxu0 %v3679_v60  ;;  %1406 = vmatmul.mubr.f32.vlgmr.msra.gmra.mrb[4].mxu1 %v3679_v60  ;;  %v3165_v46 = vpack.c.bf16 %v643_v41, %v622_v40  ;;  %v417_v40 = vld [vmem:[%s5200_s1 + $0x90] sm:$0xff]  ;;  %v438_v41 = vld [vmem:[%s5200_s1 + $0x138] sm:$0xff] }
  0x7e   : > { %3146 = vmatprep.subr.bf16.mxu0 %v3145_v52  ;;  %3182 = vmatprep.subr.bf16.mxu1 %v3181_v55  ;;  %v644_v52 = vld [vmem:[%s5200_s1 + $0x7a8] sm:$0xff]  ;;  %v666_v55 = vld [vmem:[%s5200_s1 + $0x858] sm:$0xff] }
  0x7f   : > { %3148 = vmatpush1.bf16.msra.mxu0 %v3147_v56  ;;  %3184 = vmatpush1.bf16.msra.mxu1 %v3183_v57  ;;  %v687_v56 = vld [vmem:[%s5200_s1 + $0x900] sm:$0xff]  ;;  %v3167_v57 = vpack.c.bf16 %v642_v48, %v621_v47  ;;  %v458_v42 = vld [vmem:[%s5200_s1 + $0x1d8] sm:$0xff]  ;;  %v481_v47 = vld [vmem:[%s5200_s1 + $0x290] sm:$0xff]  ;;  %v3253_v48 = vpack.c.bf16 %v439_v37, %v418_v35 }
  0x80   : > { %3150 = vmatprep.subr.bf16.mxu0 %v3149_v58  ;;  %3186 = vmatprep.subr.bf16.mxu1 %v3185_v63  ;;  %v3203_v58 = vpack.c.bf16 %v644_v52, %v623_v50  ;;  %v665_v63 = vld [vmem:[%s5200_s1 + $0x850] sm:$0xff]  ;;  %v3205_v0 = vpack.c.bf16 %v687_v56, %v666_v55  ;;  %v3221_v52 = vpack.c.bf16 %v479_v43, %v458_v42  ;;  %v459_v55 = vld [vmem:[%s5200_s1 + $0x1e0] sm:$0xff]  ;;  %v628_v35 = vld [vmem:[%s5200_s1 + $0x728] sm:$0xff] }
  0x81   : > { %2866 = vmatprep.mubr.msk.f32.mxu0 %vm919_vm0, %v3620_v36  ;;  %2869 = vmatprep.mubr.msk.f32.mxu1 %vm919_vm0, %v3620_v36  ;;  %v649_v37 = vld [vmem:[%s5200_s1 + $0x7d0] sm:$0xff]  ;;  %v646_v42 = vld [vmem:[%s5200_s1 + $0x7b8] sm:$0xff]  ;;  %v627_v43 = vld [vmem:[%s5200_s1 + $0x720] sm:$0xff] }
  0x83   : > { %3152 = vmatpush1.bf16.msra.mxu0 %v3151_v5  ;;  %3188 = vmatpush1.bf16.msra.mxu1 %v3187_v6  ;;  %v729_v5 = vld [vmem:[%s5200_s1 + $0xa50] sm:$0xff]  ;;  %v3171_v6 = vpack.c.bf16 %v684_v62, %v663_v61  ;;  %v502_v61 = vld [vmem:[%s5200_s1 + $0x338] sm:$0xff]  ;;  %v523_v62 = vld [vmem:[%s5200_s1 + $0x3e0] sm:$0xff] }
  0x84   : > { %3154 = vmatprep.subr.bf16.mxu0 %v3153_v7  ;;  %3190 = vmatprep.subr.bf16.mxu1 %v3189_v12  ;;  %v3207_v7 = vpack.c.bf16 %v686_v1, %v665_v63  ;;  %v707_v12 = vld [vmem:[%s5200_s1 + $0x9a0] sm:$0xff]  ;;  %v3209_v13 = vpack.c.bf16 %v729_v5, %v708_v4  ;;  %v3223_v63 = vpack.c.bf16 %v478_v54, %v457_v53  ;;  %v501_v4 = vld [vmem:[%s5200_s1 + $0x330] sm:$0xff] }
  0x85   : > { %v3261_v5 = vpack.c.bf16 %v523_v62, %v502_v61  ;;  %v667_v54 = vld [vmem:[%s5200_s1 + $0x860] sm:$0xff]  ;;  %v712_v62 = vld [vmem:[%s5200_s1 + $0x9c8] sm:$0xff] }
  0x86   : > { %v731_v61 = vld [vmem:[%s5200_s1 + $0xa60] sm:$0xff] }
  0x87   : > { %3156 = vmatpush1.bf16.msra.mxu0 %v3155_v18  ;;  %3192 = vmatpush1.bf16.msra.mxu1 %v3191_v19  ;;  %v771_v18 = vld [vmem:[%s5200_s1 + $0xba0] sm:$0xff]  ;;  %v3175_v19 = vpack.c.bf16 %v726_v11, %v705_v10  ;;  %v544_v10 = vld [vmem:[%s5200_s1 + $0x488] sm:$0xff]  ;;  %v565_v11 = vld [vmem:[%s5200_s1 + $0x530] sm:$0xff] }
  0x88   : > { %3158 = vmatprep.subr.bf16.mxu0 %v3157_v20  ;;  %3194 = vmatprep.subr.bf16.mxu1 %v3193_v25  ;;  %v3211_v20 = vpack.c.bf16 %v728_v14, %v707_v12  ;;  %v3213_v25 = vpack.c.bf16 %v771_v18, %v750_v17  ;;  %v3227_v12 = vpack.c.bf16 %v520_v3, %v499_v2  ;;  %v543_v17 = vld [vmem:[%s5200_s1 + $0x480] sm:$0xff]  ;;  %v709_v3 = vld [vmem:[%s5200_s1 + $0x9b0] sm:$0xff] }
  0x89   : > { %v3265_v18 = vpack.c.bf16 %v565_v11, %v544_v10  ;;  %v773_v10 = vld [vmem:[%s5200_s1 + $0xbb0] sm:$0xff]  ;;  %v754_v11 = vld [vmem:[%s5200_s1 + $0xb18] sm:$0xff] }
  0x8b   : > { %3160 = vmatpush1.bf16.msra.mxu0 %v3159_v31  ;;  %3196 = vmatpush1.bf16.msra.mxu1 %v3195_v32  ;;  %v792_v31 = vld [vmem:[%s5200_s1 + $0xc48] sm:$0x1] }
  0x8c   : > { %3162 = vmatprep.subr.bf16.mxu0 %v3161_v33  ;;  %3198 = vmatprep.subr.bf16.mxu1 %v3197_v38  ;;  %v416_v32 = vld [vmem:[%s5200_s1 + $0x88] sm:$0xff]  ;;  %v789_v33 = vld [vmem:[%s5200_s1 + $0xc30] sm:$0x1]  ;;  %v415_v38 = vld [vmem:[%s5200_s1 + $0x80] sm:$0xff] }
  0x8d   : > { %v3219_v50 = vpack.c.bf16 %v436_v39, %v415_v38 }
  0x8f   : > { %3164 = vmatpush1.bf16.msra.mxu0 %v3163_v44  ;;  %3200 = vmatpush1.bf16.msra.mxu1 %v3199_v45  ;;  %v791_v44 = vld [vmem:[%s5200_s1 + $0xc40] sm:$0x1]  ;;  %v3217_v45 = vpack.c.bf16 %v437_v34, %v416_v32  ;;  %v606_v32 = vld [vmem:[%s5200_s1 + $0x678] sm:$0xff] }
  0x90   : > { %3166 = vmatprep.subr.bf16.mxu0 %v3165_v46  ;;  %3202 = vmatprep.subr.bf16.mxu1 %v3201_v51  ;;  %v460_v46 = vld [vmem:[%s5200_s1 + $0x1e8] sm:$0xff]  ;;  %v3255_v51 = vpack.c.bf16 %v438_v41, %v417_v40  ;;  %v647_v34 = vld [vmem:[%s5200_s1 + $0x7c0] sm:$0xff]  ;;  %v625_v41 = vld [vmem:[%s5200_s1 + $0x710] sm:$0xff] }
  0x91   : > { %v3257_v56 = vpack.c.bf16 %v481_v47, %v460_v46  ;;  %v668_v46 = vld [vmem:[%s5200_s1 + $0x868] sm:$0xff]  ;;  %v689_v47 = vld [vmem:[%s5200_s1 + $0x910] sm:$0xff] }
  0x92   : > { %v3241_v53 = vpack.c.bf16 %v689_v47, %v668_v46  ;;  %v650_v46 = vld [vmem:[%s5200_s1 + $0x7d8] sm:$0xff] }
  0x93   : > { %3168 = vmatpush1.bf16.msra.mxu0 %v3167_v57  ;;  %3204 = vmatpush1.bf16.msra.mxu1 %v3203_v58  ;;  %v480_v57 = vld [vmem:[%s5200_s1 + $0x288] sm:$0xff] }
  0x94   : > { %3170 = vmatprep.subr.bf16.mxu0 %v3169_v59  ;;  %3206 = vmatprep.subr.bf16.mxu1 %v3205_v0  ;;  %v500_v58 = vld [vmem:[%s5200_s1 + $0x328] sm:$0xff]  ;;  %v521_v59 = vld [vmem:[%s5200_s1 + $0x3d0] sm:$0xff]  ;;  %v3259_v0 = vpack.c.bf16 %v480_v57, %v459_v55 }
  0x95   : > { %v3225_v1 = vpack.c.bf16 %v521_v59, %v500_v58  ;;  %v688_v55 = vld [vmem:[%s5200_s1 + $0x908] sm:$0xff]  ;;  %v690_v58 = vld [vmem:[%s5200_s1 + $0x918] sm:$0xff] }
  0x96   : > { %v710_v59 = vld [vmem:[%s5200_s1 + $0x9b8] sm:$0xff] }
  0x97   : > { %3172 = vmatpush1.bf16.msra.mxu0 %v3171_v6  ;;  %3208 = vmatpush1.bf16.msra.mxu1 %v3207_v7  ;;  %v522_v6 = vld [vmem:[%s5200_s1 + $0x3d8] sm:$0xff]  ;;  %v3245_v2 = vpack.c.bf16 %v731_v61, %v710_v59 }
  0x98   : > { %3174 = vmatprep.subr.bf16.mxu0 %v3173_v8  ;;  %3210 = vmatprep.subr.bf16.mxu1 %v3209_v13  ;;  %v542_v7 = vld [vmem:[%s5200_s1 + $0x478] sm:$0xff]  ;;  %v563_v8 = vld [vmem:[%s5200_s1 + $0x520] sm:$0xff]  ;;  %v3263_v13 = vpack.c.bf16 %v522_v6, %v501_v4 }
  0x99   : > { %v3229_v14 = vpack.c.bf16 %v563_v8, %v542_v7  ;;  %v730_v4 = vld [vmem:[%s5200_s1 + $0xa58] sm:$0xff]  ;;  %v732_v7 = vld [vmem:[%s5200_s1 + $0xa68] sm:$0xff] }
  0x9a   : > { %v752_v8 = vld [vmem:[%s5200_s1 + $0xb08] sm:$0xff] }
  0x9b   : > { %3176 = vmatpush1.bf16.msra.mxu0 %v3175_v19  ;;  %3212 = vmatpush1.bf16.msra.mxu1 %v3211_v20  ;;  %v564_v19 = vld [vmem:[%s5200_s1 + $0x528] sm:$0xff] }
  0x9c   : > { %3178 = vmatprep.subr.bf16.mxu0 %v3177_v21  ;;  %3214 = vmatprep.subr.bf16.mxu1 %v3213_v25  ;;  %v584_v20 = vld [vmem:[%s5200_s1 + $0x5c8] sm:$0xff]  ;;  %v605_v21 = vld [vmem:[%s5200_s1 + $0x670] sm:$0xff]  ;;  %v3231_v25 = vpack.c.bf16 %v562_v16, %v541_v15  ;;  %v3267_v26 = vpack.c.bf16 %v564_v19, %v543_v17  ;;  %v3249_v15 = vpack.c.bf16 %v773_v10, %v752_v8  ;;  %v751_v16 = vld [vmem:[%s5200_s1 + $0xb00] sm:$0xff] }
  0x9d   : > { %v3233_v27 = vpack.c.bf16 %v605_v21, %v584_v20  ;;  %v772_v17 = vld [vmem:[%s5200_s1 + $0xba8] sm:$0xff]  ;;  %v753_v19 = vld [vmem:[%s5200_s1 + $0xb10] sm:$0xff]  ;;  %v774_v20 = vld [vmem:[%s5200_s1 + $0xbb8] sm:$0xff] }
  0x9e   : > { %v3251_v21 = vpack.c.bf16 %v772_v17, %v751_v16  ;;  %v4709_v16 = vsub.s32 2, %v3562_v9  ;;  %v4712_v17 = vsub.s32 3, %v3562_v9 }
  0x9f   : > { %3180 = vmatpush1.bf16.msra.mxu0 %v3179_v28  ;;  %3216 = vmatpush1.bf16.msra.mxu1 %v3215_v29  ;;  %v583_v28 = vld [vmem:[%s5200_s1 + $0x5c0] sm:$0xff]  ;;  %v604_v29 = vld [vmem:[%s5200_s1 + $0x668] sm:$0xff] }
  0xa0   : > { %2864 = vmatprep.subr.msk.mxu0 %vm922_vm1, %v790_v30  ;;  %2867 = vmatprep.subr.msk.mxu1 %vm922_vm1, %v792_v31  ;;  %v585_v30 = vld [vmem:[%s5200_s1 + $0x5d0] sm:$0xff]  ;;  %v3269_v31 = vpack.c.bf16 %v607_v24, %v586_v23  ;;  %v3235_v38 = vpack.c.bf16 %v604_v29, %v583_v28  ;;  %v3287_v23 = vpack.c.bf16 %v774_v20, %v753_v19  ;;  %v794_v24 = vld [vmem:[%s5200_s1 + $0xc58] sm:$0x1]  ;;  %v795_v29 = vld [vmem:[%s5200_s1 + $0xc60] sm:$0x1] }
  0xa1   : > { %v3271_v39 = vpack.c.bf16 %v606_v32, %v585_v30  ;;  %v793_v28 = vld [vmem:[%s5200_s1 + $0xc50] sm:$0x1]  ;;  %v482_v32 = vld [vmem:[%s5200_s1 + $0x298] sm:$0xff]  ;;  %v4720_v19 = vld [vmem:[%s5201_s2 + $0x8] sm:$0xff] }
  0xa3   : > { %2865 = vmatpush1.msk.msra.mxu0 %vm922_vm1, %v789_v33  ;;  %2868 = vmatpush1.msk.msra.mxu1 %vm922_vm1, %v791_v44  ;;  %v626_v33 = vld [vmem:[%s5200_s1 + $0x718] sm:$0xff]  ;;  %v3273_v44 = vpack.c.bf16 %v649_v37, %v628_v35  ;;  %v503_v35 = vld [vmem:[%s5200_s1 + $0x340] sm:$0xff]  ;;  %v524_v37 = vld [vmem:[%s5200_s1 + $0x3e8] sm:$0xff] }
  0xa4   : > { %1477 = vmatmul.mubr.f32.vlgmr.msra.gmra.mrb[6].mxu0 %v3679_v60  ;;  %1548 = vmatmul.mubr.f32.vlgmr.msra.gmra.mrb[6].mxu1 %v3679_v60  ;;  %v3237_v40 = vpack.c.bf16 %v647_v34, %v626_v33  ;;  %v3339_v33 = vmov 0.0|0.0  }
  0xa5   : > { %3218 = vmatprep.subr.bf16.mxu0 %v3217_v45  ;;  %3254 = vmatprep.subr.bf16.mxu1 %v3253_v48  ;;  %v648_v45 = vld [vmem:[%s5200_s1 + $0x7c8] sm:$0xff]  ;;  %v670_v48 = vld [vmem:[%s5200_s1 + $0x878] sm:$0xff] }
  0xa6   : > { %3220 = vmatpush1.bf16.msra.mxu0 %v3219_v50  ;;  %3256 = vmatpush1.bf16.msra.mxu1 %v3255_v51  ;;  %v691_v50 = vld [vmem:[%s5200_s1 + $0x920] sm:$0xff]  ;;  %v3239_v51 = vpack.c.bf16 %v646_v42, %v625_v41 }
  0xa7   : > { %3222 = vmatprep.subr.bf16.mxu0 %v3221_v52  ;;  %3258 = vmatprep.subr.bf16.mxu1 %v3257_v56  ;;  %v3275_v52 = vpack.c.bf16 %v648_v45, %v627_v43  ;;  %v669_v56 = vld [vmem:[%s5200_s1 + $0x870] sm:$0xff]  ;;  %v3277_v57 = vpack.c.bf16 %v691_v50, %v670_v48  ;;  %v587_v42 = vld [vmem:[%s5200_s1 + $0x5e0] sm:$0xff]  ;;  %v608_v43 = vld [vmem:[%s5200_s1 + $0x688] sm:$0xff] }
  0xa8   : > { %2872 = vmatprep.mubr.msk.f32.mxu0 %vm919_vm0, %v3620_v36  ;;  %2875 = vmatprep.mubr.msk.f32.mxu1 %vm919_vm0, %v3620_v36  ;;  %v629_v45 = vld [vmem:[%s5200_s1 + $0x730] sm:$0xff]  ;;  %v671_v48 = vld [vmem:[%s5200_s1 + $0x880] sm:$0xff]  ;;  %v692_v50 = vld [vmem:[%s5200_s1 + $0x928] sm:$0xff] }
  0xa9   : > { %v3305_v47 = vpack.c.bf16 %v650_v46, %v629_v45 }
  0xaa   : > { %3224 = vmatpush1.bf16.msra.mxu0 %v3223_v63  ;;  %3260 = vmatpush1.bf16.msra.mxu1 %v3259_v0  ;;  %v733_v63 = vld [vmem:[%s5200_s1 + $0xa70] sm:$0xff]  ;;  %v3243_v0 = vpack.c.bf16 %v688_v55, %v667_v54  ;;  %v755_v55 = vld [vmem:[%s5200_s1 + $0xb20] sm:$0xff] }
  0xab   : > { %3226 = vmatprep.subr.bf16.mxu0 %v3225_v1  ;;  %3262 = vmatprep.subr.bf16.mxu1 %v3261_v5  ;;  %v3279_v1 = vpack.c.bf16 %v690_v58, %v669_v56  ;;  %v711_v5 = vld [vmem:[%s5200_s1 + $0x9c0] sm:$0xff]  ;;  %v3281_v6 = vpack.c.bf16 %v733_v63, %v712_v62  ;;  %v776_v56 = vld [vmem:[%s5200_s1 + $0xbc8] sm:$0xff]  ;;  %v797_v58 = vld [vmem:[%s5200_s1 + $0xc70] sm:$0x1] }
  0xae   : > { %3228 = vmatpush1.bf16.msra.mxu0 %v3227_v12  ;;  %3264 = vmatpush1.bf16.msra.mxu1 %v3263_v13  ;;  %v775_v12 = vld [vmem:[%s5200_s1 + $0xbc0] sm:$0xff]  ;;  %v3247_v13 = vpack.c.bf16 %v730_v4, %v709_v3 }
  0xaf   : > { %3230 = vmatprep.subr.bf16.mxu0 %v3229_v14  ;;  %3266 = vmatprep.subr.bf16.mxu1 %v3265_v18  ;;  %v3283_v14 = vpack.c.bf16 %v732_v7, %v711_v5  ;;  %v3285_v18 = vpack.c.bf16 %v775_v12, %v754_v11 }
  0xb2   : > { %3232 = vmatpush1.bf16.msra.mxu0 %v3231_v25  ;;  %3268 = vmatpush1.bf16.msra.mxu1 %v3267_v26  ;;  %v796_v25 = vld [vmem:[%s5200_s1 + $0xc68] sm:$0x1]  ;;  %v419_v26 = vld [vmem:[%s5200_s1 + $0xa0] sm:$0xff] }
  0xb3   : > { %3234 = vmatprep.subr.bf16.mxu0 %v3233_v27  ;;  %3270 = vmatprep.subr.bf16.mxu1 %v3269_v31  ;;  %v440_v27 = vld [vmem:[%s5200_s1 + $0x148] sm:$0xff]  ;;  %v461_v31 = vld [vmem:[%s5200_s1 + $0x1f0] sm:$0xff] }
  0xb4   : > { %v3290_v30 = vpack.c.bf16 %v440_v27, %v419_v26  ;;  %v3293_v34 = vpack.c.bf16 %v482_v32, %v461_v31  ;;  %v857_v26 = vrot.slane %v4720_v19, %v4709_v16  ;;  %v853_v27 = vrot.slane %v4720_v19, %v3593_v22 }
  0xb6   : > { %3236 = vmatpush1.bf16.msra.mxu0 %v3235_v38  ;;  %3272 = vmatpush1.bf16.msra.mxu1 %v3271_v39  ;;  %v3340_v38 = vmov 0.0   ;;  %v3296_v39 = vpack.c.bf16 %v524_v37, %v503_v35 }
  0xb7   : > { %3238 = vmatprep.subr.bf16.mxu0 %v3237_v40  ;;  %3274 = vmatprep.subr.bf16.mxu1 %v3273_v44  ;;  %v545_v40 = vld [vmem:[%s5200_s1 + $0x490] sm:$0xff]  ;;  %v3302_v44 = vpack.c.bf16 %v608_v43, %v587_v42 }
  0xba   : > { %3240 = vmatpush1.bf16.msra.mxu0 %v3239_v51  ;;  %3276 = vmatpush1.bf16.msra.mxu1 %v3275_v52  ;;  %v3308_v51 = vpack.c.bf16 %v692_v50, %v671_v48  ;;  %v713_v52 = vld [vmem:[%s5200_s1 + $0x9d0] sm:$0xff] }
  0xbb   : > { %3242 = vmatprep.subr.bf16.mxu0 %v3241_v53  ;;  %3278 = vmatprep.subr.bf16.mxu1 %v3277_v57  ;;  %v734_v53 = vld [vmem:[%s5200_s1 + $0xa78] sm:$0xff]  ;;  %v3314_v57 = vpack.c.bf16 %v776_v56, %v755_v55  ;;  %v1813_v55 = vld [vmem:[%s384_s24 + $0x20] sm:$0xff]  ;;  %v1811_v56 = vld [vmem:[%s384_s24 + $0x10] sm:$0xff] }
  0xbc   : > { %v3311_v54 = vpack.c.bf16 %v734_v53, %v713_v52 }
  0xbe   : > { %3244 = vmatpush1.bf16.msra.mxu0 %v3243_v0  ;;  %3280 = vmatpush1.bf16.msra.mxu1 %v3279_v1  ;;  %v4685_v0 = vsub.s32 6, %v3562_v9  ;;  %v4690_v1 = vld [vmem:[%s5201_s2] sm:$0xff] }
  0xbf   : > { %3246 = vmatprep.subr.bf16.mxu0 %v3245_v2  ;;  %3282 = vmatprep.subr.bf16.mxu1 %v3281_v6  ;;  %v844_v2 = vsub.s32 7, %v3562_v9  ;;  %v817_v3 = vrot.slane %v4690_v1, %v3645_v49  ;;  %v821_v20 = vrot.slane %v4690_v1, %v3593_v22 }
  0xc1   : > { %v845_v4 = vrot.slane %v4690_v1, %v844_v2 }
  0xc2   : > { %3248 = vmatpush1.bf16.msra.mxu0 %v3247_v13  ;;  %3284 = vmatpush1.bf16.msra.mxu1 %v3283_v14 }
  0xc3   : > { %3250 = vmatprep.subr.bf16.mxu0 %v3249_v15  ;;  %3286 = vmatprep.subr.bf16.mxu1 %v3285_v18  ;;  %v4715_v18 = vsub.s32 4, %v3562_v9 }
  0xc6   : > { %3252 = vmatpush1.bf16.msra.mxu0 %v3251_v21  ;;  %3288 = vmatpush1.bf16.msra.mxu1 %v3287_v23  ;;  %v825_v21 = vrot.slane %v4690_v1, %v4709_v16  ;;  %v829_v23 = vrot.slane %v4690_v1, %v4712_v17 }
  0xc7   : > { %2870 = vmatprep.subr.msk.mxu0 %vm922_vm1, %v794_v24  ;;  %2873 = vmatprep.subr.msk.mxu1 %vm922_vm1, %v796_v25  ;;  %v849_v24 = vrot.slane %v4720_v19, %v3645_v49  ;;  %v833_v25 = vrot.slane %v4690_v1, %v4715_v18 }
  0xca   : > { %2871 = vmatpush1.msk.msra.mxu0 %vm922_vm1, %v793_v28  ;;  %2874 = vmatpush1.msk.msra.mxu1 %vm922_vm1, %v795_v29  ;;  %v861_v28 = vrot.slane %v4720_v19, %v4712_v17 }
  0xcb   : > { %1619 = vmatmul.mubr.f32.vlgmr.msra.gmra.mrb[8].mxu0 %v3679_v60  ;;  %1690 = vmatmul.mubr.f32.vlgmr.msra.gmra.mrb[8].mxu1 %v3679_v60 }
  0xcc   : > { %3289 = vmatprep.subr.bf16.mxu0 %v3339_v33  ;;  %2877 = vmatprep.mubr.msk.f32.mxu0 %vm919_vm0, %v3620_v36  ;;  %v566_v36 = vld [vmem:[%s5200_s1 + $0x538] sm:$0xff] }
  0xcd   : > { %3291 = vmatpush1.bf16.msra.mxu0 %v3290_v30  ;;  %1950 = vmatprep.mubr.f32.mxu1 %v3340_v38  ;;  %v3299_v41 = vpack.c.bf16 %v566_v36, %v545_v40 }
  0xce   : > { %3292 = vmatprep.subr.bf16.mxu0 %v3339_v33 }
  0xd1   : > { %3294 = vmatpush1.bf16.msra.mxu0 %v3293_v34 }
  0xd2   : > { %3295 = vmatprep.subr.bf16.mxu0 %v3339_v33 }
  0xd5   : > { %3297 = vmatpush1.bf16.msra.mxu0 %v3296_v39 }
  0xd6   : > { %3298 = vmatprep.subr.bf16.mxu0 %v3339_v33 }
  0xd9   : > { %3300 = vmatpush1.bf16.msra.mxu0 %v3299_v41 }
  0xda   : > { %3301 = vmatprep.subr.bf16.mxu0 %v3339_v33 }
  0xdd   : > { %3303 = vmatpush1.bf16.msra.mxu0 %v3302_v44 }
  0xde   : > { %3304 = vmatprep.subr.bf16.mxu0 %v3339_v33 }
  0xe1   : > { %3306 = vmatpush1.bf16.msra.mxu0 %v3305_v47 }
  0xe2   : > { %3307 = vmatprep.subr.bf16.mxu0 %v3339_v33 }
  0xe5   : > { %3309 = vmatpush1.bf16.msra.mxu0 %v3308_v51 }
  0xe6   : > { %3310 = vmatprep.subr.bf16.mxu0 %v3339_v33 }
  0xe9   : > { %3312 = vmatpush1.bf16.msra.mxu0 %v3311_v54  ;;  %v3341_v54 = vmov 0  }
  0xea   : > { %3313 = vmatprep.subr.bf16.mxu0 %v3339_v33  ;;  %3330 = vset.pattern.permute.xlu1 %v3341_v54 }
  0xeb   : > { %3329 = vset.pattern.permute.xlu0 %v3341_v54  ;;  %1837 = vperm.xlu1 %3330, %v1813_v55  }
  0xec   : > { %1827 = vperm.xlu0 %3329, %v1811_v56  }
  0xed   : > { %3315 = vmatpush1.bf16.msra.mxu0 %v3314_v57 }
  0xee   : > { %1732 = vmatprep.subr.mxu0 %v3340_v38 }
  0xf1   : > { %2876 = vmatpush1.msk.msra.mxu0 %vm922_vm1, %v797_v58  ;;  %v1814_v58 = vld [vmem:[%s384_s24 + $0x28] sm:$0xff] }
  0xf2   : > { %1761 = vmatmul.mubr.f32.vlgmr.msra.gmra.mrb[10].mxu0 %v3679_v60  ;;  %v841_v60 = vrot.slane %v4690_v1, %v4685_v0  ;;  %1842 = vperm.xlu1 %3330, %v1814_v58  }
  0xf3   : > { %2152 = vmatprep.mubr.f32.mxu0 %v3340_v38 }
 0x102   : > { %v1052_v59 = vpop.f32.mrb[0].mxu0 }
 0x103   : > { %v1054_v61 = vpop.f32.mrb[1].mxu0  ;;  %v1123_v62 = vpop.f32.mrb[0].mxu1  ;;  %v1053_v8 = vadd.f32 %v1052_v59, %v817_v3  ;;  %v1812_v59 = vld [vmem:[%s384_s24 + $0x18] sm:$0xff]  ;;  %v4765_v3 = vsub.s32 5, %v3562_v9 }
 0x104   : > { %v1125_v63 = vpop.f32.mrb[1].mxu1  ;;  %v1055_v29 = vadd.f32 %v1054_v61, %v821_v20  ;;  %v1124_v30 = vadd.f32 %v1123_v62, %v825_v21  ;;  %1832 = vperm.xlu0 %3329, %v1812_v59   ;;  %v1810_v61 = vld [vmem:[%s384_s24 + $0x8] sm:$0xff]  ;;  %v1809_v62 = vld [vmem:[%s384_s24] sm:$0xff] }
 0x105   : > { %v1766_v14 = vsel %vm922_vm1, %v1053_v8, 0.0  ;;  %v1126_v32 = vadd.f32 %v1125_v63, %v829_v23  ;;  %1822 = vperm.xlu1 %3330, %v1810_v61   ;;  %v2487_v63 = vld [vmem:[%s388_s28] sm:$0x7]  ;;  %v877_v8 = vrot.slane %v4720_v19, %v844_v2  ;;  %s3317_s28 = smul.u32 28, %s5211_s10 }
 0x106   : > { %v1773_v43 = vsel %vm922_vm1, %v1055_v29, 0.0  ;;  %v1778_v44 = vsel %vm922_vm1, %v1124_v30, 0.0 }
 0x107   : > { %v1783_v47 = vsel %vm922_vm1, %v1126_v32, 0.0  ;;  %v4811_v32 = vld [vmem:[%s379_s26 + $0x18] sm:$0xff] }
 0x108   : > { %1817 = vperm.xlu0 %3329, %v1809_v62  }
 0x10c   : > { %2490 = vperm.xlu0 %3329, %v2487_v63  }
 0x129   : > { %v1194_v5 = vpop.f32.mrb[2].mxu0  ;;  %v1265_v6 = vpop.f32.mrb[2].mxu1 }
 0x12a   : > { %v4700_v7 = vpop.f32.mrb[3].mxu0  ;;  %v4702_v10 = vadd.f32 %v1265_v6, %v841_v60  ;;  %v1267_v11 = vpop.f32.mrb[3].mxu1  ;;  %v1195_v37 = vadd.f32 %v1194_v5, %v833_v25  ;;  %v837_v60 = vrot.slane %v4690_v1, %v4765_v3  ;;  %v873_v5 = vrot.slane %v4720_v19, %v4685_v0 }
 0x12b   : > { %v1268_v12 = vadd.f32 %v1267_v11, %v845_v4  ;;  %v865_v4 = vrot.slane %v4720_v19, %v4715_v18  ;;  %v869_v6 = vrot.slane %v4720_v19, %v4765_v3 }
 0x12c   : > { %v1788_v51 = vsel %vm922_vm1, %v1195_v37, 0.0  ;;  %v1197_v11 = vadd.f32 %v4700_v7, %v837_v60  ;;  %v1798_v9 = vsel %vm922_vm1, %v4702_v10, 0.0  ;;  %v4801_v10 = vld [vmem:[%s379_s26 + $0x8] sm:$0xff] }
 0x12d   : > { %v1767_v13 = vrot.slane %v1268_v12, 7 }
 0x12f   : > { %v4706_v15 = vsel %vm1768_vm2, %v1767_v13, %v1766_v14 }
 0x150   : > { %v1336_v31 = vpop.f32.mrb[4].mxu0  ;;  %v1407_v34 = vpop.f32.mrb[4].mxu1 }
 0x151   : > { %v1337_v33 = vadd.f32 %v1336_v31, %v849_v24  ;;  %v1338_v35 = vpop.f32.mrb[5].mxu0  ;;  %v1408_v39 = vadd.f32 %v1407_v34, %v857_v26  ;;  %v1409_v36 = vpop.f32.mrb[5].mxu1  ;;  %v1793_v26 = vsel %vm922_vm1, %v1197_v11, 0.0  ;;  %v4794_v31 = vld [vmem:[%s379_s26] sm:$0xff]  ;;  %v4821_v34 = vld [vmem:[%s379_s26 + $0x28] sm:$0xff] }
 0x152   : > { %v1339_v40 = vadd.f32 %v1338_v35, %v853_v27  ;;  %v1410_v42 = vadd.f32 %v1409_v36, %v861_v28  ;;  %v800_v35 = vld [vmem:[%s5201_s2 + $0x10] sm:$0x1f] }
 0x153   : > { %v1774_v41 = vrot.slane %v1337_v33, 7  ;;  %v1784_v45 = vrot.slane %v1408_v39, 7  ;;  %v4816_v33 = vld [vmem:[%s379_s26 + $0x20] sm:$0xff]  ;;  %v881_v37 = vrot.slane %v800_v35, %v3645_v49  ;;  %v889_v39 = vrot.slane %v800_v35, %v4709_v16 }
 0x154   : > { %v1779_v46 = vrot.slane %v1339_v40, 7  ;;  %v1789_v50 = vrot.slane %v1410_v42, 7  ;;  %v885_v40 = vrot.slane %v800_v35, %v3593_v22  ;;  %v893_v36 = vrot.slane %v800_v35, %v4712_v17 }
 0x155   : > { %v1775_v48 = vsel %vm1768_vm2, %v1774_v41, %v1773_v43  ;;  %v4750_v52 = vsel %vm1768_vm2, %v1784_v45, %v1783_v47 }
 0x156   : > { %v4753_v53 = vsel %vm1768_vm2, %v1779_v46, %v1778_v44  ;;  %v4756_v57 = vsel %vm1768_vm2, %v1789_v50, %v1788_v51 }
 0x177   : > { %v1478_v12 = vpop.f32.mrb[6].mxu0  ;;  %v1549_v14 = vpop.f32.mrb[6].mxu1 }
 0x178   : > { %v1479_v13 = vadd.f32 %v1478_v12, %v865_v4  ;;  %v1480_v1 = vpop.f32.mrb[7].mxu0  ;;  %v1550_v20 = vadd.f32 %v1549_v14, %v873_v5  ;;  %v1551_v23 = vpop.f32.mrb[7].mxu1 }
 0x179   : > { %v1481_v21 = vadd.f32 %v1480_v1, %v869_v6  ;;  %v1552_v25 = vadd.f32 %v1551_v23, %v877_v8  ;;  %v4897_v4 = vpop.permute.xlu1 %1837 }
 0x17a   : > { %v1794_v24 = vrot.slane %v1479_v13, 7  ;;  %v1770_v27 = vrot.slane %v1550_v20, 6 }
 0x17b   : > { %v1799_v28 = vrot.slane %v1481_v21, 7  ;;  %v1776_v7 = vrot.slane %v1552_v25, 6  ;;  %v2284_v21 = vld [vmem:[%s5204_s5] sm:$0xff] }
 0x17c   : > { %v1795_v2 = vsel %vm1768_vm2, %v1794_v24, %v1793_v26  ;;  %v1772_v19 = vsel %vm1771_vm3, %v1770_v27, %v4706_v15  ;;  %v4806_v15 = vld [vmem:[%s379_s26 + $0x10] sm:$0xff]  ;;  %v2285_v24 = vld [vmem:[%s5204_s5 + $0x8] sm:$0xff]  ;;  %v2291_v27 = vld [vmem:[%s5204_s5 + $0x38] sm:$0xff]  ;;  %s5131_s26 = scalar_lea.vmem %s5207_s8, %s3317_s28 }
 0x17d   : > { %v4791_v29 = vsel %vm1768_vm2, %v1799_v28, %v1798_v9  ;;  %v1777_v30 = vsel %vm1771_vm3, %v1776_v7, %v1775_v48  ;;  %v4901_v6 = vpop.permute.xlu1 %1842 }
 0x17e   : > { %2878 = vmatprep.subr.msk.mxu1 %vm1864_vm4, %v1777_v30 }
 0x17f   : > { %2879 = vmatpush1.msk.msra.mxu1 %vm1864_vm4, %v1772_v19 }
 0x180   : > { %2880 = vmatmul.mubr.msk.f32.vlgmr.msra.gmra.mrb[10].mxu1 %vm1845_vm5, %v4794_v31 }
 0x181   : > { %1956 = vmatprep.mubr.f32.mxu1 %v3340_v38 }
 0x184   : > { %2881 = vmatmul.mubr.msk.f32.gmra.mrb[12].mxu1 %vm1845_vm5, %v4801_v10  ;;  %v4906_v14 = vpop.permute.xlu1 %1822 }
 0x185   : > { %1962 = vmatprep.mubr.f32.mxu1 %v3340_v38 }
 0x188   : > { %2882 = vmatmul.mubr.msk.f32.gmra.mrb[14].mxu1 %vm1845_vm5, %v4806_v15 }
 0x189   : > { %1968 = vmatprep.mubr.f32.mxu1 %v3340_v38 }
 0x18c   : > { %2883 = vmatmul.mubr.msk.f32.gmra.mrb[16].mxu1 %vm1845_vm5, %v4811_v32 }
 0x18d   : > { %1974 = vmatprep.mubr.f32.mxu1 %v3340_v38 }
 0x190   : > { %2884 = vmatmul.mubr.msk.f32.gmra.mrb[18].mxu1 %vm1845_vm5, %v4816_v33 }
 0x191   : > { %1980 = vmatprep.mubr.f32.mxu1 %v3340_v38 }
 0x194   : > { %2885 = vmatmul.mubr.msk.f32.gmra.mrb[20].mxu1 %vm1845_vm5, %v4821_v34 }
 0x195   : > { %2051 = vmatprep.mubr.f32.mxu1 %v3340_v38 }
 0x19e   : > { %v1620_v41 = vpop.f32.mrb[8].mxu0  ;;  %v1691_v43 = vpop.f32.mrb[8].mxu1 }
 0x19f   : > { %v1621_v42 = vadd.f32 %v1620_v41, %v881_v37  ;;  %v1622_v44 = vpop.f32.mrb[9].mxu0  ;;  %v1692_v45 = vadd.f32 %v1691_v43, %v889_v39  ;;  %v1693_v47 = vpop.f32.mrb[9].mxu1 }
 0x1a0   : > { %v1623_v46 = vadd.f32 %v1622_v44, %v885_v40  ;;  %v1694_v50 = vadd.f32 %v1693_v47, %v893_v36 }
 0x1a1   : > { %v1781_v48 = vrot.slane %v1621_v42, 6  ;;  %v1791_v51 = vrot.slane %v1692_v45, 6 }
 0x1a2   : > { %v1786_v54 = vrot.slane %v1623_v46, 6  ;;  %v1796_v56 = vrot.slane %v1694_v50, 6 }
 0x1a3   : > { %v1782_v55 = vsel %vm1771_vm3, %v1781_v48, %v4753_v53  ;;  %v1792_v58 = vsel %vm1771_vm3, %v1791_v51, %v4756_v57 }
 0x1a4   : > { %v1787_v59 = vsel %vm1771_vm3, %v1786_v54, %v4750_v52  ;;  %v1797_v61 = vsel %vm1771_vm3, %v1796_v56, %v1795_v2  ;;  %v897_v52 = vrot.slane %v800_v35, %v4715_v18  ;;  %v2292_v2 = vld [vmem:[%s5204_s5 + $0x40] sm:$0xff] }
 0x1a5   : > { %2886 = vmatprep.subr.msk.mxu1 %vm1864_vm4, %v1787_v59  ;;  %2894 = vmatprep.subr.msk.mxu0 %vm1864_vm4, %v1797_v61 }
 0x1a6   : > { %2887 = vmatpush1.msk.msra.mxu1 %vm1864_vm4, %v1782_v55  ;;  %2895 = vmatpush1.msk.msra.mxu0 %vm1864_vm4, %v1792_v58 }
 0x1a7   : > { %2888 = vmatmul.mubr.msk.f32.vlgmr.msra.gmra.mrb[22].mxu1 %vm1845_vm5, %v4794_v31  ;;  %2896 = vmatmul.mubr.msk.f32.vlgmr.msra.gmra.mrb[12].mxu0 %vm1845_vm5, %v4794_v31 }
 0x1a8   : > { %2057 = vmatprep.mubr.f32.mxu1 %v3340_v38  ;;  %2158 = vmatprep.mubr.f32.mxu0 %v3340_v38 }
 0x1ab   : > { %2889 = vmatmul.mubr.msk.f32.gmra.mrb[24].mxu1 %vm1845_vm5, %v4801_v10  ;;  %2897 = vmatmul.mubr.msk.f32.gmra.mrb[14].mxu0 %vm1845_vm5, %v4801_v10 }
 0x1ac   : > { %2063 = vmatprep.mubr.f32.mxu1 %v3340_v38  ;;  %2164 = vmatprep.mubr.f32.mxu0 %v3340_v38 }
 0x1af   : > { %2890 = vmatmul.mubr.msk.f32.gmra.mrb[26].mxu1 %vm1845_vm5, %v4806_v15  ;;  %2898 = vmatmul.mubr.msk.f32.gmra.mrb[16].mxu0 %vm1845_vm5, %v4806_v15 }
 0x1b0   : > { %2069 = vmatprep.mubr.f32.mxu1 %v3340_v38  ;;  %2170 = vmatprep.mubr.f32.mxu0 %v3340_v38 }
 0x1b3   : > { %2891 = vmatmul.mubr.msk.f32.gmra.mrb[28].mxu1 %vm1845_vm5, %v4811_v32  ;;  %2899 = vmatmul.mubr.msk.f32.gmra.mrb[18].mxu0 %vm1845_vm5, %v4811_v32 }
 0x1b4   : > { %2075 = vmatprep.mubr.f32.mxu1 %v3340_v38  ;;  %2176 = vmatprep.mubr.f32.mxu0 %v3340_v38 }
 0x1b7   : > { %2892 = vmatmul.mubr.msk.f32.gmra.mrb[30].mxu1 %vm1845_vm5, %v4816_v33  ;;  %2900 = vmatmul.mubr.msk.f32.gmra.mrb[20].mxu0 %vm1845_vm5, %v4816_v33 }
 0x1b8   : > { %2081 = vmatprep.mubr.f32.mxu1 %v3340_v38  ;;  %2182 = vmatprep.mubr.f32.mxu0 %v3340_v38  ;;  %v4895_v38 = vpop.permute.xlu0 %1827 }
 0x1bb   : > { %2893 = vmatmul.mubr.msk.f32.gmra.mrb[32].mxu1 %vm1845_vm5, %v4821_v34  ;;  %2901 = vmatmul.mubr.msk.f32.gmra.mrb[22].mxu0 %vm1845_vm5, %v4821_v34 }
 0x1bc   : > { %2920 = vmatprep.mubr.msk.f32.mxu1 %vm1845_vm5, %v4794_v31  ;;  %v4899_v5 = vpop.permute.xlu0 %1832 }
 0x1c0   : > { %v4903_v8 = vpop.permute.xlu0 %1817 }
 0x1c5   : > { %v1762_v53 = vpop.f32.mrb[10].mxu0 }
 0x1c6   : > { %v1763_v57 = vadd.f32 %v1762_v53, %v897_v52  ;;  %v1764_v62 = vpop.f32.mrb[11].mxu0 }
 0x1c8   : > { %v1801_v63 = vrot.slane %v1763_v57, 6 }
 0x1ca   : > { %v1802_v60 = vsel %vm1771_vm3, %v1801_v63, %v4791_v29 }
 0x1cb   : > { %2918 = vmatprep.subr.msk.mxu1 %vm1864_vm4, %v1802_v60 }
 0x1cc   : > { %2919 = vmatpush3.msk.msra.mxu1 %vm1864_vm4, %v1802_v60 }
 0x1cd   : > { %2921 = vmatmul.mubr.msk.f32.vlgmr.msra.gmra.mrb[34].mxu1 %vm1845_vm5, %v4801_v10 }
 0x1ce   : > { %2923 = vmatprep.mubr.msk.f32.mxu1 %vm1845_vm5, %v4806_v15 }
 0x1d1   : > { %2924 = vmatmul.mubr.msk.f32.gmra.mrb[36].mxu1 %vm1845_vm5, %v4811_v32 }
 0x1d2   : > { %2926 = vmatprep.mubr.msk.f32.mxu1 %vm1845_vm5, %v4816_v33 }
 0x1d5   : > { %2927 = vmatmul.mubr.msk.f32.gmra.mrb[38].mxu1 %vm1845_vm5, %v4821_v34 }
 0x253   : > { %v1952_v11 = vpop.f32.mrb[10].mxu1 }
 0x254   : > { %v1954_v12 = vpop.f32.mrb[11].mxu1  ;;  %v1953_v13 = vadd.f32 %v1952_v11, %v4903_v8 }
 0x255   : > { %v1955_v1 = vadd.f32 %v1954_v12, %v4903_v8 }
 0x256   : > { %v2298_v26 = vmul.f32 %v2284_v21, %v1953_v13 }
 0x257   : > { %v1958_v20 = vpop.f32.mrb[12].mxu1  ;;  %v2299_v9 = vmul.f32 %v2285_v24, %v1955_v1 }
 0x258   : > { %v1960_v23 = vpop.f32.mrb[13].mxu1  ;;  %v1959_v25 = vadd.f32 %v1958_v20, %v4906_v14 }
 0x259   : > { %v1961_v28 = vadd.f32 %v1960_v23, %v4906_v14 }
 0x25a   : > { %v2305_v7 = vmul.f32 %v2291_v27, %v1959_v25  ;;  %v4931_v25 = vpop.permute.xlu0 %2490 }
 0x25b   : > { %v1964_v19 = vpop.f32.mrb[14].mxu1  ;;  %v2306_v29 = vmul.f32 %v2292_v2, %v1961_v28 }
 0x25c   : > { %v1965_v30 = vadd.f32 %v1964_v19, %v4895_v38  ;;  %v1966_v31 = vpop.f32.mrb[15].mxu1  ;;  %v2340_v10 = vadd.f32 %v2305_v7, %v2298_v26 }
 0x25d   : > { %v1967_v15 = vadd.f32 %v1966_v31, %v4895_v38  ;;  %v2347_v32 = vadd.f32 %v2306_v29, %v2299_v9 }
 0x25e   : > { %v2341_v33 = vrot.slane %v2340_v10, 4  ;;  %v2312_v37 = vmul.f32 %v2284_v21, %v1965_v30 }
 0x25f   : > { %v1970_v34 = vpop.f32.mrb[16].mxu1  ;;  %v2348_v35 = vrot.slane %v2347_v32, 4  ;;  %v2313_v41 = vmul.f32 %v2285_v24, %v1967_v15 }
 0x260   : > { %v1972_v39 = vpop.f32.mrb[17].mxu1  ;;  %v1971_v40 = vadd.f32 %v1970_v34, %v4899_v5  ;;  %v2342_v36 = vadd.f32 %v2341_v33, %v2340_v10 }
 0x261   : > { %v1973_v42 = vadd.f32 %v1972_v39, %v4899_v5  ;;  %v2349_v43 = vadd.f32 %v2348_v35, %v2347_v32 }
 0x262   : > { %v2319_v44 = vmul.f32 %v2291_v27, %v1971_v40  ;;  %v2343_v45 = vrot.slane %v2342_v36, 2 }
 0x263   : > { %v1976_v46 = vpop.f32.mrb[18].mxu1  ;;  %v2320_v47 = vmul.f32 %v2292_v2, %v1973_v42  ;;  %v2350_v48 = vrot.slane %v2349_v43, 2 }
 0x264   : > { %v1977_v50 = vadd.f32 %v1976_v46, %v4897_v4  ;;  %v1978_v51 = vpop.f32.mrb[19].mxu1  ;;  %v2389_v54 = vadd.f32 %v2319_v44, %v2312_v37  ;;  %v2344_v55 = vadd.f32 %v2343_v45, %v2342_v36 }
 0x265   : > { %v1979_v56 = vadd.f32 %v1978_v51, %v4897_v4  ;;  %v2396_v58 = vadd.f32 %v2320_v47, %v2313_v41  ;;  %v2351_v59 = vadd.f32 %v2350_v48, %v2349_v43 }
 0x266   : > { %v2390_v61 = vrot.slane %v2389_v54, 4  ;;  %v2345_v52 = vrot.slane %v2344_v55, 1  ;;  %v2326_v63 = vmul.f32 %v2284_v21, %v1977_v50 }
 0x267   : > { %v1982_v53 = vpop.f32.mrb[20].mxu1  ;;  %v2397_v57 = vrot.slane %v2396_v58, 4  ;;  %v2352_v62 = vrot.slane %v2351_v59, 1  ;;  %v2327_v1 = vmul.f32 %v2285_v24, %v1979_v56  ;;  %v4938_v24 = vld [vmem:[%s5206_s7] sm:$0xff] }
 0x268   : > { %v1983_v60 = vadd.f32 %v1982_v53, %v4901_v6  ;;  %v2391_v11 = vadd.f32 %v2390_v61, %v2389_v54  ;;  %v1984_v12 = vpop.f32.mrb[21].mxu1  ;;  %v2346_v13 = vadd.f32 %v2345_v52, %v2344_v55  ;;  %v2587_v40 = vrot.slane %v4938_v24, %v3645_v49 }
 0x269   : > { %v1985_v20 = vadd.f32 %v1984_v12, %v4901_v6  ;;  %v2398_v23 = vadd.f32 %v2397_v57, %v2396_v58  ;;  %v2353_v26 = vadd.f32 %v2352_v62, %v2351_v59  ;;  %v2591_v42 = vrot.slane %v4938_v24, %v3593_v22 }
 0x26a   : > { %v2333_v28 = vmul.f32 %v2291_v27, %v1983_v60  ;;  %v2392_v9 = vrot.slane %v2391_v11, 2  ;;  %v2497_v7 = vadd.f32 %v4931_v25, %v2346_v13  ;;  %v4941_v27 = vrot.slane %v4931_v25, 1 }
 0x26b   : > { %v2334_v19 = vmul.f32 %v2292_v2, %v1985_v20  ;;  %v2399_v29 = vrot.slane %v2398_v23, 2  ;;  %v2498_v21 = vadd.f32 %v4931_v25, %v2353_v26  ;;  %v4950_v49 = vrot.slane %v4931_v25, 2  ;;  %v4963_v26 = vld [vmem:[%s5204_s5 + $0x10] sm:$0xff] }
 0x26c   : > { %v2393_v30 = vadd.f32 %v2392_v9, %v2391_v11  ;;  %v2438_v31 = vadd.f32 %v2333_v28, %v2326_v63  ;;  %v2619_v48 = vmul.f32 %v2587_v40, %v2497_v7  ;;  %v4969_v9 = vld [vmem:[%s5204_s5 + $0x18] sm:$0xff] }
 0x26d   : > { %v2400_v10 = vadd.f32 %v2399_v29, %v2398_v23  ;;  %v2445_v15 = vadd.f32 %v2334_v19, %v2327_v1  ;;  %v2539_v32 = vcombine.low %v2497_v7, %v2498_v21  ;;  %v2620_v55 = vmul.f32 %v2591_v42, %v2498_v21 }
 0x26e   : > { %v2394_v33 = vrot.slane %v2393_v30, 1  ;;  %v2439_v34 = vrot.slane %v2438_v31, 4  ;;  %v4975_v21 = vrot.slane %v4938_v24, %v4709_v16  ;;  %v4993_v16 = vrot.slane %v4938_v24, %v4765_v3 }
 0x26f   : > { %v2401_v35 = vrot.slane %v2400_v10, 1  ;;  %v2446_v2 = vrot.slane %v2445_v15, 4 }
 0x270   : > { %v2395_v37 = vadd.f32 %v2394_v33, %v2393_v30  ;;  %v2440_v39 = vadd.f32 %v2439_v34, %v2438_v31  ;;  %v4979_v30 = vrot.slane %v4938_v24, %v4712_v17  ;;  %v4984_v31 = vld [vmem:[%s5204_s5 + $0x20] sm:$0xff]  ;;  %v4998_v17 = vld [vmem:[%s5204_s5 + $0x48] sm:$0xff] }
 0x271   : > { %v2402_v36 = vadd.f32 %v2401_v35, %v2400_v10  ;;  %v2447_v41 = vadd.f32 %v2446_v2, %v2445_v15  ;;  %v5003_v34 = vld [vmem:[%s5204_s5 + $0x28] sm:$0xff] }
 0x272   : > { %v2441_v43 = vrot.slane %v2440_v39, 2  ;;  %v2504_v44 = vadd.f32 %v4941_v27, %v2395_v37 }
 0x273   : > { %v2448_v45 = vrot.slane %v2447_v41, 2  ;;  %v2505_v46 = vadd.f32 %v4941_v27, %v2402_v36 }
 0x274   : > { %v2442_v47 = vadd.f32 %v2441_v43, %v2440_v39  ;;  %v2626_v50 = vmul.f32 %v2587_v40, %v2504_v44 }
 0x275   : > { %v2449_v51 = vadd.f32 %v2448_v45, %v2447_v41  ;;  %v2542_v54 = vcombine.low %v2504_v44, %v2505_v46  ;;  %v2627_v56 = vmul.f32 %v2591_v42, %v2505_v46  ;;  %v5016_v41 = vld [vmem:[%s5204_s5 + $0x58] sm:$0xff] }
 0x276   : > { %v2443_v58 = vrot.slane %v2442_v47, 1  ;;  %v2661_v59 = vrot.slane %v2626_v50, 7 }
 0x277   : > { %v2450_v61 = vrot.slane %v2449_v51, 1  ;;  %v2548_v22 = vrot.slane %v2542_v54, 7  ;;  %v2665_v52 = vrot.slane %v2627_v56, 7 }
 0x278   : > { %v2444_v53 = vadd.f32 %v2443_v58, %v2442_v47  ;;  %v2662_v57 = vsel %vm1768_vm2, %v2661_v59, %v2619_v48  ;;  %v5024_v47 = vld [vmem:[%s5204_s5 + $0x60] sm:$0xff] }
 0x279   : > { %v2451_v62 = vadd.f32 %v2450_v61, %v2449_v51  ;;  %v2666_v60 = vsel %vm1768_vm2, %v2665_v52, %v2620_v55  ;;  %v2549_v11 = vsel %vm1768_vm2, %v2548_v22, %v2539_v32  ;;  %v4989_v32 = vrot.slane %v4938_v24, %v4715_v18 }
 0x27a   : > { %v2053_v63 = vpop.f32.mrb[22].mxu1  ;;  %v2154_v1 = vpop.f32.mrb[12].mxu0  ;;  %v2511_v20 = vadd.f32 %v4950_v49, %v2444_v53  ;;  %v4958_v23 = vsel %vm2550_vm6, %v2548_v22, %v2549_v11 }
 0x27b   : > { %v2054_v12 = vadd.f32 %v2053_v63, %v4903_v8  ;;  %v2055_v13 = vpop.f32.mrb[23].mxu1  ;;  %v2155_v7 = vadd.f32 %v2154_v1, %v4903_v8  ;;  %v2156_v19 = vpop.f32.mrb[13].mxu0  ;;  %v2512_v29 = vadd.f32 %v4950_v49, %v2451_v62 }
 0x27c   : > { %v2056_v28 = vadd.f32 %v2055_v13, %v4903_v8  ;;  %v2157_v10 = vadd.f32 %v2156_v19, %v4903_v8  ;;  %v2633_v15 = vmul.f32 %v2587_v40, %v2511_v20  ;;  %v5011_v40 = vld [vmem:[%s5204_s5 + $0x50] sm:$0xff] }
 0x27d   : > { %v2545_v35 = vcombine.low %v2511_v20, %v2512_v29  ;;  %v2634_v2 = vmul.f32 %v2591_v42, %v2512_v29  ;;  %v2300_v18 = vmul.f32 %v4963_v26, %v2054_v12  ;;  %v2302_v44 = vmul.f32 %v4984_v31, %v2155_v7 }
 0x27e   : > { %v2059_v33 = vpop.f32.mrb[24].mxu1  ;;  %v2301_v37 = vmul.f32 %v4969_v9, %v2056_v28  ;;  %v2160_v36 = vpop.f32.mrb[14].mxu0  ;;  %v2663_v43 = vrot.slane %v2633_v15, 6  ;;  %v2303_v51 = vmul.f32 %v5003_v34, %v2157_v10 }
 0x27f   : > { %v2060_v3 = vadd.f32 %v2059_v33, %v4906_v14  ;;  %v2061_v39 = vpop.f32.mrb[25].mxu1  ;;  %v2161_v45 = vadd.f32 %v2160_v36, %v4906_v14  ;;  %v2162_v46 = vpop.f32.mrb[15].mxu0  ;;  %v2667_v48 = vrot.slane %v2634_v2, 6  ;;  %v5032_v61 = vrot.slane %v2545_v35, 6 }
 0x280   : > { %v2062_v42 = vadd.f32 %v2061_v39, %v4906_v14  ;;  %v2163_v54 = vadd.f32 %v2162_v46, %v4906_v14  ;;  %v2664_v55 = vsel %vm1771_vm3, %v2663_v43, %v2662_v57 }
 0x281   : > { %v2307_v50 = vmul.f32 %v4998_v17, %v2060_v3  ;;  %v2309_v59 = vmul.f32 %v5016_v41, %v2161_v45  ;;  %v5035_v22 = vsel %vm1771_vm3, %v2667_v48, %v2666_v60  ;;  %v5040_v12 = vsel %vm1864_vm4, %v2664_v55, 0.0 }
 0x282   : > { %v2308_v56 = vmul.f32 %v5011_v40, %v2062_v42  ;;  %v2065_v58 = vpop.f32.mrb[26].mxu1  ;;  %v2310_v63 = vmul.f32 %v5024_v47, %v2163_v54  ;;  %v2166_v11 = vpop.f32.mrb[16].mxu0 }
 0x283   : > { %v2354_v52 = vadd.f32 %v2307_v50, %v2300_v18  ;;  %v2066_v53 = vadd.f32 %v2065_v58, %v4895_v38  ;;  %v2067_v62 = vpop.f32.mrb[27].mxu1  ;;  %v2368_v1 = vadd.f32 %v2309_v59, %v2302_v44  ;;  %v2167_v20 = vadd.f32 %v2166_v11, %v4895_v38  ;;  %v2168_v28 = vpop.f32.mrb[17].mxu0 }
 0x284   : > { %v2361_v57 = vadd.f32 %v2308_v56, %v2301_v37  ;;  %v2068_v13 = vadd.f32 %v2067_v62, %v4895_v38  ;;  %v2375_v19 = vadd.f32 %v2310_v63, %v2303_v51  ;;  %v2169_v29 = vadd.f32 %v2168_v28, %v4895_v38 }
 0x285   : > { %v2355_v7 = vrot.slane %v2354_v52, 4  ;;  %v2314_v60 = vmul.f32 %v4963_v26, %v2066_v53  ;;  %v2369_v35 = vrot.slane %v2368_v1, 4  ;;  %v2316_v2 = vmul.f32 %v4984_v31, %v2167_v20 }
 0x286   : > { %v2362_v10 = vrot.slane %v2361_v57, 4  ;;  %v2315_v15 = vmul.f32 %v4969_v9, %v2068_v13  ;;  %v2071_v33 = vpop.f32.mrb[28].mxu1  ;;  %v2376_v39 = vrot.slane %v2375_v19, 4  ;;  %v2317_v36 = vmul.f32 %v5003_v34, %v2169_v29  ;;  %v2172_v43 = vpop.f32.mrb[18].mxu0 }
 0x287   : > { %v2356_v18 = vadd.f32 %v2355_v7, %v2354_v52  ;;  %v2072_v37 = vadd.f32 %v2071_v33, %v4899_v5  ;;  %v2073_v3 = vpop.f32.mrb[29].mxu1  ;;  %v2370_v44 = vadd.f32 %v2369_v35, %v2368_v1  ;;  %v2173_v46 = vadd.f32 %v2172_v43, %v4899_v5  ;;  %v2174_v48 = vpop.f32.mrb[19].mxu0 }
 0x288   : > { %v2363_v42 = vadd.f32 %v2362_v10, %v2361_v57  ;;  %v2074_v45 = vadd.f32 %v2073_v3, %v4899_v5  ;;  %v2377_v54 = vadd.f32 %v2376_v39, %v2375_v19  ;;  %v2175_v55 = vadd.f32 %v2174_v48, %v4899_v5 }
 0x289   : > { %v2357_v50 = vrot.slane %v2356_v18, 2  ;;  %v2321_v51 = vmul.f32 %v4998_v17, %v2072_v37  ;;  %v2371_v58 = vrot.slane %v2370_v44, 2  ;;  %v2323_v53 = vmul.f32 %v5016_v41, %v2173_v46 }
 0x28a   : > { %v2364_v56 = vrot.slane %v2363_v42, 2  ;;  %v2322_v59 = vmul.f32 %v5011_v40, %v2074_v45  ;;  %v2077_v52 = vpop.f32.mrb[30].mxu1  ;;  %v2378_v11 = vrot.slane %v2377_v54, 2  ;;  %v2178_v1 = vpop.f32.mrb[20].mxu0 }
 0x28b   : > { %v2358_v62 = vadd.f32 %v2357_v50, %v2356_v18  ;;  %v2403_v63 = vadd.f32 %v2321_v51, %v2314_v60  ;;  %v2078_v57 = vadd.f32 %v2077_v52, %v4897_v4  ;;  %v2079_v13 = vpop.f32.mrb[31].mxu1  ;;  %v2372_v28 = vadd.f32 %v2371_v58, %v2370_v44  ;;  %v2180_v29 = vpop.f32.mrb[21].mxu0 }
 0x28c   : > { %v2365_v20 = vadd.f32 %v2364_v56, %v2363_v42  ;;  %v2410_v7 = vadd.f32 %v2322_v59, %v2315_v15  ;;  %v2080_v19 = vadd.f32 %v2079_v13, %v4897_v4  ;;  %v2379_v35 = vadd.f32 %v2378_v11, %v2377_v54 }
 0x28d   : > { %v2359_v10 = vrot.slane %v2358_v62, 1  ;;  %v2404_v33 = vrot.slane %v2403_v63, 4  ;;  %v2328_v37 = vmul.f32 %v4963_v26, %v2078_v57  ;;  %v2373_v39 = vrot.slane %v2372_v28, 1 }
 0x28e   : > { %v2366_v3 = vrot.slane %v2365_v20, 1  ;;  %v2411_v18 = vrot.slane %v2410_v7, 4  ;;  %v2329_v60 = vmul.f32 %v4969_v9, %v2080_v19  ;;  %v2083_v43 = vpop.f32.mrb[32].mxu1  ;;  %v2380_v48 = vrot.slane %v2379_v35, 1  ;;  %v2184_v44 = vpop.f32.mrb[22].mxu0 }
 0x28f   : > { %v2360_v45 = vadd.f32 %v2359_v10, %v2358_v62  ;;  %v2405_v46 = vadd.f32 %v2404_v33, %v2403_v63  ;;  %v2084_v42 = vadd.f32 %v2083_v43, %v4901_v6  ;;  %v2085_v15 = vpop.f32.mrb[33].mxu1  ;;  %v2374_v51 = vadd.f32 %v2373_v39, %v2372_v28  ;;  %v2186_v54 = vpop.f32.mrb[23].mxu0 }
 0x290   : > { %v2367_v50 = vadd.f32 %v2366_v3, %v2365_v20  ;;  %v2412_v56 = vadd.f32 %v2411_v18, %v2410_v7  ;;  %v2417_v58 = vadd.f32 %v2323_v53, %v2316_v2  ;;  %v2381_v26 = vadd.f32 %v2380_v48, %v2379_v35 }
 0x291   : > { %v2406_v59 = vrot.slane %v2405_v46, 2  ;;  %v5062_v52 = vadd.f32 %v4931_v25, %v2360_v45  ;;  %v2335_v9 = vmul.f32 %v4998_v17, %v2084_v42  ;;  %v2324_v63 = vmul.f32 %v5024_v47, %v2175_v55 }
 0x292   : > { %v2413_v11 = vrot.slane %v2412_v56, 2  ;;  %v2418_v62 = vrot.slane %v2417_v58, 4  ;;  %v2086_v57 = vadd.f32 %v2085_v15, %v4901_v6  ;;  %v2179_v20 = vadd.f32 %v2178_v1, %v4897_v4 }
 0x293   : > { %v2407_v13 = vadd.f32 %v2406_v59, %v2405_v46  ;;  %v2452_v19 = vadd.f32 %v2335_v9, %v2328_v37  ;;  %v2181_v2 = vadd.f32 %v2180_v29, %v4897_v4  ;;  %v2424_v7 = vadd.f32 %v2324_v63, %v2317_v36 }
 0x294   : > { %v2414_v53 = vadd.f32 %v2413_v11, %v2412_v56  ;;  %v2419_v28 = vadd.f32 %v2418_v62, %v2417_v58  ;;  %v2336_v10 = vmul.f32 %v5011_v40, %v2086_v57  ;;  %v2330_v17 = vmul.f32 %v4984_v31, %v2179_v20 }
 0x295   : > { %v2408_v33 = vrot.slane %v2407_v13, 1  ;;  %v2453_v35 = vrot.slane %v2452_v19, 4  ;;  %v2331_v3 = vmul.f32 %v5003_v34, %v2181_v2  ;;  %v2425_v18 = vrot.slane %v2424_v7, 4 }
 0x296   : > { %v2415_v55 = vrot.slane %v2414_v53, 1  ;;  %v2420_v39 = vrot.slane %v2419_v28, 2  ;;  %v2459_v43 = vadd.f32 %v2336_v10, %v2329_v60  ;;  %v2185_v1 = vadd.f32 %v2184_v44, %v4901_v6 }
 0x297   : > { %v2409_v37 = vadd.f32 %v2408_v33, %v2407_v13  ;;  %v2454_v45 = vadd.f32 %v2453_v35, %v2452_v19  ;;  %v2187_v29 = vadd.f32 %v2186_v54, %v4901_v6  ;;  %v2426_v48 = vadd.f32 %v2425_v18, %v2424_v7 }
 0x298   : > { %v2416_v46 = vadd.f32 %v2415_v55, %v2414_v53  ;;  %v2421_v36 = vadd.f32 %v2420_v39, %v2419_v28  ;;  %v2460_v40 = vrot.slane %v2459_v43, 4  ;;  %v2337_v15 = vmul.f32 %v5016_v41, %v2185_v1  ;;  %v2297_v55 = vld [vmem:[%s5204_s5 + $0x68] sm:$0xff] }
 0x299   : > { %v2455_v42 = vrot.slane %v2454_v45, 2  ;;  %v2338_v31 = vmul.f32 %v5024_v47, %v2187_v29  ;;  %v5077_v34 = vadd.f32 %v4931_v25, %v2367_v50  ;;  %v2427_v60 = vrot.slane %v2426_v48, 2  ;;  %v2290_v29 = vld [vmem:[%s5204_s5 + $0x30] sm:$0xff] }
 0x29a   : > { %v2422_v56 = vrot.slane %v2421_v36, 1  ;;  %v2461_v58 = vadd.f32 %v2460_v40, %v2459_v43  ;;  %v5080_v59 = vadd.f32 %v4931_v25, %v2374_v51  ;;  %v2466_v54 = vadd.f32 %v2337_v15, %v2330_v17 }
 0x29b   : > { %v2456_v44 = vadd.f32 %v2455_v42, %v2454_v45  ;;  %v2473_v9 = vadd.f32 %v2338_v31, %v2331_v3  ;;  %v5083_v11 = vadd.f32 %v4931_v25, %v2381_v26  ;;  %v2428_v63 = vadd.f32 %v2427_v60, %v2426_v48 }
 0x29c   : > { %v2423_v62 = vadd.f32 %v2422_v56, %v2421_v36  ;;  %v2462_v41 = vrot.slane %v2461_v58, 2  ;;  %v5086_v47 = vadd.f32 %v4941_v27, %v2409_v37  ;;  %v2467_v57 = vrot.slane %v2466_v54, 4 }
 0x29d   : > { %v2457_v50 = vrot.slane %v2456_v44, 1  ;;  %v2474_v13 = vrot.slane %v2473_v9, 4  ;;  %v5089_v19 = vadd.f32 %v4941_v27, %v2416_v46  ;;  %v2429_v20 = vrot.slane %v2428_v63, 1 }
 0x29e   : > { %v2508_v51 = vadd.f32 %v4941_v27, %v2423_v62  ;;  %v2463_v2 = vadd.f32 %v2462_v41, %v2461_v58  ;;  %v2540_v26 = vcombine.low %v5062_v52, %v5077_v34  ;;  %v2468_v28 = vadd.f32 %v2467_v57, %v2466_v54 }
 0x29f   : > { %v2458_v53 = vadd.f32 %v2457_v50, %v2456_v44  ;;  %v2475_v7 = vadd.f32 %v2474_v13, %v2473_v9  ;;  %v2541_v10 = vcombine.low %v5080_v59, %v5083_v11  ;;  %v2430_v35 = vadd.f32 %v2429_v20, %v2428_v63 }
 0x2a0   : > { %v5097_v33 = vmul.f32 %v4989_v32, %v2508_v51  ;;  %v2464_v17 = vrot.slane %v2463_v2, 1  ;;  %v2922_v3 = vpop.f32.mrb[34].mxu1  ;;  %v2543_v39 = vcombine.low %v5086_v47, %v5089_v19  ;;  %v2469_v43 = vrot.slane %v2468_v28, 2 }
 0x2a1   : > { %v2513_v18 = vadd.f32 %v4950_v49, %v2458_v53  ;;  %v2476_v37 = vrot.slane %v2475_v7, 2  ;;  %v2261_v45 = vadd.f32 %v2922_v3, %v4906_v14  ;;  %v2255_v1 = vpop.f32.mrb[35].mxu1  ;;  %v2509_v46 = vadd.f32 %v4941_v27, %v2430_v35 }
 0x2a2   : > { %v2465_v36 = vadd.f32 %v2464_v17, %v2463_v2  ;;  %v2256_v48 = vadd.f32 %v2255_v1, %v4903_v8  ;;  %v2556_v40 = vrot.slane %v2543_v39, 7  ;;  %v2470_v15 = vadd.f32 %v2469_v43, %v2468_v28 }
 0x2a3   : > { %v5112_v42 = vmul.f32 %v4975_v21, %v2513_v18  ;;  %v2477_v31 = vadd.f32 %v2476_v37, %v2475_v7  ;;  %v2311_v56 = vmul.f32 %v2297_v55, %v2261_v45  ;;  %v2544_v60 = vcombine.low %v2508_v51, %v2509_v46 }
 0x2a4   : > { %v2514_v14 = vadd.f32 %v4950_v49, %v2465_v36  ;;  %v2304_v58 = vmul.f32 %v2290_v29, %v2256_v48  ;;  %v2925_v44 = vpop.f32.mrb[36].mxu1  ;;  %v2557_v54 = vsel %vm1768_vm2, %v2556_v40, %v2540_v26  ;;  %v2471_v62 = vrot.slane %v2470_v15, 1 }
 0x2a5   : > { %v2671_v9 = vrot.slane %v5112_v42, 6  ;;  %v2478_v8 = vrot.slane %v2477_v31, 1  ;;  %v2271_v63 = vadd.f32 %v2925_v44, %v4899_v5  ;;  %v2265_v41 = vpop.f32.mrb[37].mxu1  ;;  %v2562_v50 = vrot.slane %v2544_v60, 7 }
 0x2a6   : > { %v2546_v57 = vcombine.low %v2513_v18, %v2514_v14  ;;  %v2382_v13 = vadd.f32 %v2311_v56, %v2304_v58  ;;  %v2266_v20 = vadd.f32 %v2265_v41, %v4895_v38  ;;  %v2472_v51 = vadd.f32 %v2471_v62, %v2470_v15 }
 0x2a7   : > { %v2479_v2 = vadd.f32 %v2478_v8, %v2477_v31  ;;  %v2325_v53 = vmul.f32 %v2297_v55, %v2271_v63  ;;  %v2558_v28 = vsel %vm2550_vm6, %v2556_v40, %v2557_v54  ;;  %v2563_v3 = vsel %vm1768_vm2, %v2562_v50, %v2541_v10 }
 0x2a8   : > { %v2559_v7 = vrot.slane %v2546_v57, 6  ;;  %v2383_v26 = vrot.slane %v2382_v13, 4  ;;  %v2318_v35 = vmul.f32 %v2290_v29, %v2266_v20  ;;  %v2928_v17 = vpop.f32.mrb[38].mxu1  ;;  %v2515_v5 = vadd.f32 %v4950_v49, %v2472_v51 }
 0x2a9   : > { %v2281_v39 = vadd.f32 %v2928_v17, %v4901_v6  ;;  %v2275_v18 = vpop.f32.mrb[39].mxu1  ;;  %v2516_v43 = vadd.f32 %v4950_v49, %v2479_v2  ;;  %v2564_v38 = vsel %vm2550_vm6, %v2562_v50, %v2563_v3  ;;  %v2621_v40 = vmul.f32 %v4975_v21, %v5062_v52 }
 0x2aa   : > { %v2384_v37 = vadd.f32 %v2383_v26, %v2382_v13  ;;  %v2431_v45 = vadd.f32 %v2325_v53, %v2318_v35  ;;  %v2276_v1 = vadd.f32 %v2275_v18, %v4897_v4  ;;  %v2560_v36 = vsel %vm1771_vm3, %v2559_v7, %v2558_v28 }
 0x2ab   : > { %v2339_v48 = vmul.f32 %v2297_v55, %v2281_v39  ;;  %v2547_v10 = vcombine.low %v2515_v5, %v2516_v43  ;;  %v2561_v6 = vsel %vm2554_vm7, %v2559_v7, %v2560_v36  ;;  %v2622_v4 = vmul.f32 %v4979_v30, %v5077_v34 }
 0x2ac   : > { %v2385_v15 = vrot.slane %v2384_v37, 2  ;;  %v2432_v31 = vrot.slane %v2431_v45, 4  ;;  %v2332_v56 = vmul.f32 %v2290_v29, %v2276_v1  ;;  %2579 = vst [vmem:[%s5131_s26 + $0x8] sm:$0x77] %v2561_v6  ;;  %v2623_v60 = vmul.f32 %v4989_v32, %v5080_v59 }
 0x2ad   : > { %v2565_v55 = vrot.slane %v2547_v10, 6  ;;  %v2624_v58 = vmul.f32 %v4993_v16, %v5083_v11  ;;  %v2628_v44 = vmul.f32 %v4975_v21, %v5086_v47  ;;  %v2629_v29 = vmul.f32 %v4979_v30, %v5089_v19 }
 0x2ae   : > { %v2386_v54 = vadd.f32 %v2385_v15, %v2384_v37  ;;  %v2433_v52 = vadd.f32 %v2432_v31, %v2431_v45  ;;  %v2480_v62 = vadd.f32 %v2339_v48, %v2332_v56  ;;  %v2631_v34 = vmul.f32 %v4993_v16, %v2509_v46 }
 0x2af   : > { %v2566_v8 = vsel %vm1771_vm3, %v2565_v55, %v2564_v38  ;;  %v2636_v63 = vmul.f32 %v4979_v30, %v2514_v14  ;;  %v2637_v59 = vmul.f32 %v4989_v32, %v2515_v5  ;;  %v2638_v21 = vmul.f32 %v4993_v16, %v2516_v43 }
 0x2b0   : > { %v2387_v41 = vrot.slane %v2386_v54, 1  ;;  %v2434_v50 = vrot.slane %v2433_v52, 2  ;;  %v2481_v11 = vrot.slane %v2480_v62, 4  ;;  %v2567_v57 = vsel %vm2554_vm7, %v2565_v55, %v2566_v8 }
 0x2b1   : > { %2580 = vst [vmem:[%s5131_s26 + $0x10] sm:$0x77] %v2567_v57  ;;  %v2669_v47 = vrot.slane %v2628_v44, 7  ;;  %v2673_v13 = vrot.slane %v2629_v29, 7  ;;  %v2675_v20 = vrot.slane %v2636_v63, 6  ;;  %v2677_v46 = vrot.slane %v5097_v33, 7 }
 0x2b2   : > { %v2388_v19 = vadd.f32 %v2387_v41, %v2386_v54  ;;  %v2435_v51 = vadd.f32 %v2434_v50, %v2433_v52  ;;  %v2482_v2 = vadd.f32 %v2481_v11, %v2480_v62  ;;  %v2679_v14 = vrot.slane %v2637_v59, 6 }
 0x2b3   : > { %v2670_v30 = vsel %vm1768_vm2, %v2669_v47, %v2621_v40  ;;  %v2674_v32 = vsel %vm1768_vm2, %v2673_v13, %v2622_v4  ;;  %v2681_v53 = vrot.slane %v2631_v34, 7  ;;  %v2697_v26 = vsel %vm1864_vm4, %v5035_v22, 0.0 }
 0x2b4   : > { %v2436_v28 = vrot.slane %v2435_v51, 1  ;;  %v2483_v7 = vrot.slane %v2482_v2, 2  ;;  %v2672_v16 = vsel %vm1771_vm3, %v2671_v9, %v2670_v30  ;;  %v2676_v35 = vsel %vm1771_vm3, %v2675_v20, %v2674_v32 }
 0x2b5   : > { %v2678_v17 = vsel %vm1768_vm2, %v2677_v46, %v2623_v60  ;;  %v2682_v33 = vsel %vm1768_vm2, %v2681_v53, %v2624_v58  ;;  %v2683_v3 = vrot.slane %v2638_v21, 6  ;;  %v2611_v5 = vrot.slane %v4938_v24, %v4685_v0 }
 0x2b6   : > { %v2437_v39 = vadd.f32 %v2436_v28, %v2435_v51  ;;  %v2484_v18 = vadd.f32 %v2483_v7, %v2482_v2  ;;  %v2680_v43 = vsel %vm1771_vm3, %v2679_v14, %v2678_v17  ;;  %v2503_v42 = vadd.f32 %v4931_v25, %v2388_v19 }
 0x2b7   : > { %v2684_v9 = vsel %vm1771_vm3, %v2683_v3, %v2682_v33  ;;  %v2698_v22 = vadd.f32 %v2697_v26, %v5040_v12  ;;  %v2699_v38 = vsel %vm1864_vm4, %v2672_v16, 0.0  ;;  %v2701_v1 = vsel %vm1864_vm4, %v2676_v35, 0.0 }
 0x2b8   : > { %v2510_v37 = vadd.f32 %v4941_v27, %v2437_v39  ;;  %v2485_v45 = vrot.slane %v2484_v18, 1  ;;  %v2553_v0 = vsel %vm1771_vm3, %v5032_v61, %v4958_v23  ;;  %v2625_v6 = vmul.f32 %v2611_v5, %v2503_v42 }
 0x2b9   : > { %v2700_v36 = vadd.f32 %v2699_v38, %v2698_v22  ;;  %v2555_v25 = vsel %vm2554_vm7, %v5032_v61, %v2553_v0  ;;  %v2703_v31 = vsel %vm1864_vm4, %v2680_v43, 0.0  ;;  %v2705_v61 = vsel %vm1864_vm4, %v2684_v9, 0.0 }
 0x2ba   : > { %v2568_v24 = vrot.slane %v2510_v37, 7  ;;  %v2486_v48 = vadd.f32 %v2485_v45, %v2484_v18  ;;  %v2632_v10 = vmul.f32 %v2611_v5, %v2510_v37  ;;  %2578 = vst [vmem:[%s5131_s26] sm:$0x77] %v2555_v25 }
 0x2bb   : > { %v2702_v12 = vadd.f32 %v2701_v1, %v2700_v36 }
 0x2bc   : > { %v2517_v27 = vadd.f32 %v4950_v49, %v2486_v48  ;;  %v2569_v40 = vsel %vm1768_vm2, %v2568_v24, %v2503_v42  ;;  %v2685_v15 = vrot.slane %v2632_v10, 7 }
 0x2bd   : > { %v2570_v23 = vsel %vm2550_vm6, %v2568_v24, %v2569_v40  ;;  %v2704_v56 = vadd.f32 %v2703_v31, %v2702_v12 }
 0x2be   : > { %v2571_v4 = vrot.slane %v2517_v27, 6  ;;  %v2639_v55 = vmul.f32 %v2611_v5, %v2517_v27  ;;  %v2686_v60 = vsel %vm1768_vm2, %v2685_v15, %v2625_v6 }
 0x2bf   : > { %v2706_v58 = vadd.f32 %v2705_v61, %v2704_v56 }
 0x2c0   : > { %v2572_v44 = vsel %vm1771_vm3, %v2571_v4, %v2570_v23  ;;  %v2687_v54 = vrot.slane %v2639_v55, 6 }
 0x2c1   : > { %v2573_v49 = vsel %vm2554_vm7, %v2571_v4, %v2572_v44 }
 0x2c2   : > { %2581 = vst [vmem:[%s5131_s26 + $0x18] sm:$0x7] %v2573_v49  ;;  %v2688_v52 = vsel %vm1771_vm3, %v2687_v54, %v2686_v60 }
 0x2c3   : > { %v2707_v62 = vsel %vm1864_vm4, %v2688_v52, 0.0 }
 0x2c4   : > { %v2708_v29 = vadd.f32 %v2707_v62, %v2706_v58 }
 0x2c6   : > { %2709 = vadd.xlane.f32.xlu1 %v2708_v29 }
 0x353   : > { %v2710_v8 = vpop.xlane.xlu1 %2709 }
 0x354   : > { %2712 = vst.msk [vmem:[%s397_s14] sm:$0x7] %vm2711_vm8, %v2710_v8 }
 0x355 PF: > { %s20_s30 = sadd.s32 1, %s3337_s30  }
 0x356   : > { %p17_p4 = scmp.ge.s32.totalorder %s20_s30, 4  }
 0x358   :  { %19 = sbr.rel (!%p17_p4) target bundleno = 1 (0x1), region = 103 }

</bundles_post_ra>
